<compile_context>
chip_gen: v5e
topology: v5e:2x2
jax: 0.10.0
libtpu: 0.0.40
codegen_flags: <defaults>
</compile_context>

<pallas_src>
import functools

import jax
import jax.numpy as jnp
from jax.experimental import pallas as pl
from jax.experimental.pallas import tpu as pltpu


def _round_up(x: int, m: int) -> int:
    return (x + m - 1) // m * m


def _vmem_budget_bytes() -> int:
    """~75% of physical VMEM; conservative 64 MiB (v7x) if the query fails."""
    cap = None
    try:
        info = pltpu.get_tpu_info()
        cap = getattr(info, "vmem_capacity_bytes", None)
    except Exception:
        cap = None
    if not cap:
        cap = 64 * 1024 * 1024
    return int(cap) * 3 // 4


def _vmem_bytes(n_pad, d_pad, tm, tk, x_resident) -> int:
    a_bytes = 2 * tm * tk * 2                                  # A tiles (bf16), 2 bufs
    x_bytes = n_pad * d_pad * 2 if x_resident else 2 * tk * d_pad * 2
    acc_in_bytes = 2 * tm * d_pad * 4                          # running sum in (f32)
    out_bytes = 2 * tm * d_pad * (2 + 4)                       # bf16 x_next + f32 acc
    scratch_bytes = tm * d_pad * 4
    return a_bytes + x_bytes + acc_in_bytes + out_bytes + scratch_bytes + (2 << 20)


def _plan(n: int, d: int, vmem_budget: int):
    """Pick (n_pad, d_pad, tm, tk, x_resident): largest A tiles that fit VMEM."""
    d_pad = _round_up(d, 128)                  # lane-dense output
    tm = 512 if n >= 1024 else 256             # multiple of 256 (MXU) and 128
    tk_cands = [t for t in (4096, 2048, 1024, 512, 256) if t <= _round_up(n, 256)]
    for tk in tk_cands:                        # prefer >= 2-4 MiB A tiles
        n_pad = _round_up(n, max(tm, tk))
        for x_resident in (True, False):       # resident x first, streamed fallback
            if _vmem_bytes(n_pad, d_pad, tm, tk, x_resident) <= vmem_budget:
                return n_pad, d_pad, tm, tk, x_resident
    return _round_up(n, 256), d_pad, 256, 256, False


def _layer_kernel(a_ref, x_ref, acc_in_ref, x_out_ref, acc_out_ref, acc_sc,
                  *, tk, x_resident):
    """One (row-block, k-block) step of  x_next = A @ x ;  acc += x_next.

    a_ref:      (tm, tk)        bf16 tile of the normalized adjacency
    x_ref:      (n_pad, d_pad)  bf16 resident x   OR  (tk, d_pad) streamed tile
    acc_in_ref: (tm, d_pad)     f32 running layer-sum (aliased with acc_out)
    x_out_ref:  (tm, d_pad)     bf16 next-layer x
    acc_out_ref:(tm, d_pad)     f32 updated running layer-sum
    acc_sc:     (tm, d_pad)     f32 VMEM accumulator scratch
    """
    k = pl.program_id(1)

    @pl.when(k == 0)
    def _():
        acc_sc[...] = jnp.zeros_like(acc_sc)

    if x_resident:
        off = pl.multiple_of(k * tk, tk)
        x_blk = x_ref[pl.ds(off, tk), :]
    else:
        x_blk = x_ref[...]

    acc_sc[...] += jnp.dot(a_ref[...], x_blk, preferred_element_type=jnp.float32)

    @pl.when(k == pl.num_programs(1) - 1)
    def _():
        x_new = acc_sc[...]
        x_out_ref[...] = x_new.astype(x_out_ref.dtype)    # bf16 for the next layer
        acc_out_ref[...] = acc_in_ref[...] + x_new        # f32 running layer-sum


def _make_layer_call(n_pad, d_pad, tm, tk, x_resident, vmem_limit):
    grid = (n_pad // tm, n_pad // tk)

    if x_resident:
        # Whole current-layer x held once in VMEM (no double buffering).
        x_spec = pl.BlockSpec(memory_space=pltpu.MemorySpace.VMEM)
    else:
        # Streamed fallback when resident x does not fit the VMEM budget.
        x_spec = pl.BlockSpec((tk, d_pad), lambda i, k: (k, 0))

    flops = 2 * n_pad * n_pad * d_pad
    bytes_accessed = (n_pad * n_pad * 2                                   # A (bf16)
                      + (1 if x_resident else grid[0]) * n_pad * d_pad * 2  # x reads
                      + n_pad * d_pad * (4 + 2 + 4))                      # acc in/outs

    kernel = functools.partial(_layer_kernel, tk=tk, x_resident=x_resident)

    return pl.pallas_call(
        kernel,
        out_shape=(jax.ShapeDtypeStruct((n_pad, d_pad), jnp.bfloat16),   # x_next
                   jax.ShapeDtypeStruct((n_pad, d_pad), jnp.float32)),   # acc
        grid_spec=pltpu.PrefetchScalarGridSpec(
            num_scalar_prefetch=0,
            grid=grid,
            in_specs=[
                pl.BlockSpec((tm, tk), lambda i, k: (i, k)),       # A tiles
                x_spec,                                            # current-layer x
                pl.BlockSpec((tm, d_pad), lambda i, k: (i, 0)),    # running sum (in)
            ],
            out_specs=(
                pl.BlockSpec((tm, d_pad), lambda i, k: (i, 0)),    # bf16 x_next
                pl.BlockSpec((tm, d_pad), lambda i, k: (i, 0)),    # f32 acc (out)
            ),
            scratch_shapes=[pltpu.VMEM((tm, d_pad), jnp.float32)],
        ),
        input_output_aliases={2: 1},            # acc updated in place
        compiler_params=pltpu.CompilerParams(
            dimension_semantics=("parallel", "arbitrary"),
            vmem_limit_bytes=vmem_limit,
        ),
        cost_estimate=pl.CostEstimate(
            flops=flops, transcendentals=0, bytes_accessed=bytes_accessed),
    )


@functools.partial(jax.jit, static_argnums=(2,))
def lightgcn_forward(embedding_weight: jnp.ndarray,
                     edge_index: jnp.ndarray,
                     num_layers: int) -> jnp.ndarray:
    """Equivalent of LightGCNModel.forward(edge_index).

    embedding_weight: [N, D] float32
    edge_index:       [2, E] int32 (row = source, col = target)
    """
    n, d = embedding_weight.shape
    row, col = edge_index[0], edge_index[1]

    # --- LightGCNConv normalization (XLA glue; matches the PyTorch conv) ---
    deg = jnp.zeros((n,), jnp.float32).at[col].add(1.0)
    deg_inv_sqrt = jnp.where(deg > 0, jax.lax.rsqrt(deg), 0.0)
    norm = deg_inv_sqrt[row] * deg_inv_sqrt[col]

    vmem_budget = _vmem_budget_bytes()
    n_pad, d_pad, tm, tk, x_resident = _plan(n, d, vmem_budget)

    # Dense normalized adjacency built directly at the padded shape in f32
    # (exact duplicate-edge accumulation), cast once to bf16 for the MXU.
    #   out[c] += norm * x[r]  <=>  A[c, r] += norm.
    a_bf16 = (jnp.zeros((n_pad, n_pad), jnp.float32)
              .at[col, row].add(norm)
              .astype(jnp.bfloat16))

    x0 = jnp.pad(embedding_weight.astype(jnp.float32),
                 ((0, n_pad - n), (0, d_pad - d)))

    layer_call = _make_layer_call(n_pad, d_pad, tm, tk, x_resident, vmem_budget)

    # Layer loop: A streamed exactly once per layer; the per-layer bf16 cast and
    # the running-sum add live inside the kernel (acc aliased in place).
    x = x0.astype(jnp.bfloat16)
    acc = x0
    for _ in range(num_layers):
        x, acc = layer_call(a_bf16, x, acc)

    out = acc * (1.0 / float(num_layers + 1))
    return out[:n, :d].astype(embedding_weight.dtype)


def lightgcn_forward_ref(embedding_weight, edge_index, num_layers):
    """Pure-JAX f32 reference of the PyTorch forward (for sanity check)."""
    n = embedding_weight.shape[0]
    row, col = edge_index[0], edge_index[1]
    deg = jnp.zeros((n,), dtype=embedding_weight.dtype).at[col].add(1.0)
    deg_inv_sqrt = jnp.where(deg > 0, jax.lax.rsqrt(deg), 0.0)
    norm = deg_inv_sqrt[row] * deg_inv_sqrt[col]

    x = embedding_weight
    layers = [x]
    for _ in range(num_layers):
        msgs = norm[:, None] * x[row]                # message
        x = jnp.zeros_like(x).at[col].add(msgs)      # aggr='add'
        layers.append(x)
    return jnp.mean(jnp.stack(layers, axis=0), axis=0)


if __name__ == "__main__":
    # Small, deterministic synthetic problem.
    num_nodes = 64
    embedding_size = 32
    num_layers = 3
    num_edges = 256

    key = jax.random.PRNGKey(0)
    k_emb, k_row, k_col = jax.random.split(key, 3)

    # nn.init.normal_(embedding.weight, std=0.1)
    emb = 0.1 * jax.random.normal(k_emb, (num_nodes, embedding_size),
                                  dtype=jnp.float32)

    row = jax.random.randint(k_row, (num_edges,), 0, num_nodes, dtype=jnp.int32)
    col = jax.random.randint(k_col, (num_edges,), 0, num_nodes, dtype=jnp.int32)
    edge_index = jnp.stack([row, col], axis=0)

    out = jax.block_until_ready(lightgcn_forward(emb, edge_index, num_layers))
    ref = jax.block_until_ready(lightgcn_forward_ref(emb, edge_index, num_layers))

    assert out.shape == (num_nodes, embedding_size)
    # bf16 MXU operands with f32 accumulation -> bf16-scale tolerance vs f32 ref.
    max_err = float(jnp.max(jnp.abs(out - ref)))
    assert jnp.allclose(out, ref, atol=8e-3, rtol=5e-2), max_err

    print("KERNEL_OK")
</pallas_src>

<mosaic_0001>
module attributes {stable_mosaic.version = 11 : i64} {
  func.func @_layer_kernel(%arg0: i32, %arg1: i32, %arg2: memref<256x256xbf16, #tpu.memory_space<vmem>>, %arg3: memref<256x128xbf16, #tpu.memory_space<vmem>>, %arg4: memref<256x128xf32, #tpu.memory_space<vmem>>, %arg5: memref<256x128xbf16, #tpu.memory_space<vmem>>, %arg6: memref<256x128xf32, #tpu.memory_space<vmem>>, %arg7: memref<256x128xf32, #tpu.memory_space<vmem>>) attributes {dimension_semantics = [#tpu.dimension_semantics<parallel>, #tpu.dimension_semantics<arbitrary>], iteration_bounds = array<i64: 1, 1>, scalar_prefetch = 0 : i64, scratch_operands = 1 : i64, tpu.core_type = #tpu.core_type<tc>, window_params = [{transform_indices = @transform_0, window_bounds = array<i64: 256, 256>}, {pipeline_mode = #tpu.pipeline_mode<synchronous>, transform_indices = @transform_1, window_bounds = array<i64: 256, 128>}, {transform_indices = @transform_2, window_bounds = array<i64: 256, 128>}, {transform_indices = @transform_3, window_bounds = array<i64: 256, 128>}, {transform_indices = @transform_4, window_bounds = array<i64: 256, 128>}]} {
    %c0_i32 = arith.constant 0 : i32
    %0 = arith.cmpi eq, %arg1, %c0_i32 : i32
    %1 = arith.extui %0 : i1 to i32
    %c0_i32_0 = arith.constant 0 : i32
    %2 = arith.cmpi ne, %1, %c0_i32_0 : i32
    scf.if %2 {
      %cst_9 = arith.constant 0.000000e+00 : f32
      %15 = vector.broadcast %cst_9 : f32 to vector<256x128xf32>
      %c0_10 = arith.constant 0 : index
      %c0_11 = arith.constant 0 : index
      %16 = vector.load %arg7[%c0_10, %c0_11] : memref<256x128xf32, #tpu.memory_space<vmem>>, vector<256x128xf32>
      tpu.vector_store %arg7[%c0_10, %c0_11], %15 {strides = array<i32>} : memref<256x128xf32, #tpu.memory_space<vmem>>, vector<256x128xf32>,
    } else {
    }
    %c256_i32 = arith.constant 256 : i32
    %3 = arith.muli %arg1, %c256_i32 : i32
    %4 = tpu.assume_multiple %3, 256 : i32
    %5 = arith.index_cast %4 : i32 to index
    %c0 = arith.constant 0 : index
    %6 = vector.load %arg3[%5, %c0] : memref<256x128xbf16, #tpu.memory_space<vmem>>, vector<256x128xbf16>
    %c0_1 = arith.constant 0 : index
    %c0_2 = arith.constant 0 : index
    %7 = vector.load %arg7[%c0_1, %c0_2] : memref<256x128xf32, #tpu.memory_space<vmem>>, vector<256x128xf32>
    %c0_3 = arith.constant 0 : index
    %c0_4 = arith.constant 0 : index
    %8 = vector.load %arg2[%c0_3, %c0_4] : memref<256x256xbf16, #tpu.memory_space<vmem>>, vector<256x256xbf16>
    %cst = arith.constant dense<0.000000e+00> : vector<256x128xf32>
    %9 = tpu.matmul %8, %6, %cst {dimension_numbers = #tpu.dot_dimension_numbers<[1], [0], [0], [1], [0, 0, 1, 1], [], []>} : vector<256x256xbf16>, vector<256x128xbf16>, vector<256x128xf32> -> vector<256x128xf32>
    %10 = arith.addf %7, %9 : vector<256x128xf32>
    %c0_5 = arith.constant 0 : index
    %c0_6 = arith.constant 0 : index
    %11 = vector.load %arg7[%c0_5, %c0_6] : memref<256x128xf32, #tpu.memory_space<vmem>>, vector<256x128xf32>
    tpu.vector_store %arg7[%c0_5, %c0_6], %10 {strides = array<i32>} : memref<256x128xf32, #tpu.memory_space<vmem>>, vector<256x128xf32>,
    %c0_i32_7 = arith.constant 0 : i32
    %12 = arith.cmpi eq, %arg1, %c0_i32_7 : i32
    %13 = arith.extui %12 : i1 to i32
    %c0_i32_8 = arith.constant 0 : i32
    %14 = arith.cmpi ne, %13, %c0_i32_8 : i32
    scf.if %14 {
      %c0_9 = arith.constant 0 : index
      %c0_10 = arith.constant 0 : index
      %15 = vector.load %arg7[%c0_9, %c0_10] : memref<256x128xf32, #tpu.memory_space<vmem>>, vector<256x128xf32>
      %16 = arith.truncf %15 : vector<256x128xf32> to vector<256x128xbf16>
      %c0_11 = arith.constant 0 : index
      %c0_12 = arith.constant 0 : index
      %17 = vector.load %arg5[%c0_11, %c0_12] : memref<256x128xbf16, #tpu.memory_space<vmem>>, vector<256x128xbf16>
      tpu.vector_store %arg5[%c0_11, %c0_12], %16 {strides = array<i32>} : memref<256x128xbf16, #tpu.memory_space<vmem>>, vector<256x128xbf16>,
      %c0_13 = arith.constant 0 : index
      %c0_14 = arith.constant 0 : index
      %18 = vector.load %arg4[%c0_13, %c0_14] : memref<256x128xf32, #tpu.memory_space<vmem>>, vector<256x128xf32>
      %19 = arith.addf %18, %15 : vector<256x128xf32>
      %c0_15 = arith.constant 0 : index
      %c0_16 = arith.constant 0 : index
      %20 = vector.load %arg6[%c0_15, %c0_16] : memref<256x128xf32, #tpu.memory_space<vmem>>, vector<256x128xf32>
      tpu.vector_store %arg6[%c0_15, %c0_16], %19 {strides = array<i32>} : memref<256x128xf32, #tpu.memory_space<vmem>>, vector<256x128xf32>,
    } else {
    }
    return
  }
  func.func @transform_0(%arg0: i32, %arg1: i32) -> (i32, i32) {
    %c0_i32 = arith.constant 0 : i32
    return %arg0, %arg1 : i32, i32
  }
  func.func @transform_1(%arg0: i32, %arg1: i32) -> (i32, i32) {
    %c0_i32 = arith.constant 0 : i32
    %c0_i32_0 = arith.constant 0 : i32
    %c0_i32_1 = arith.constant 0 : i32
    return %c0_i32, %c0_i32_0 : i32, i32
  }
  func.func @transform_2(%arg0: i32, %arg1: i32) -> (i32, i32) {
    %c0_i32 = arith.constant 0 : i32
    %c0_i32_0 = arith.constant 0 : i32
    return %arg0, %c0_i32 : i32, i32
  }
  func.func @transform_3(%arg0: i32, %arg1: i32) -> (i32, i32) {
    %c0_i32 = arith.constant 0 : i32
    %c0_i32_0 = arith.constant 0 : i32
    return %arg0, %c0_i32 : i32, i32
  }
  func.func @transform_4(%arg0: i32, %arg1: i32) -> (i32, i32) {
    %c0_i32 = arith.constant 0 : i32
    %c0_i32_0 = arith.constant 0 : i32
    return %arg0, %c0_i32 : i32, i32
  }
}

module attributes {stable_mosaic.version = 11 : i64} {
  func.func @_layer_kernel(%arg0: i32, %arg1: i32, %arg2: memref<256x256xbf16, #tpu.memory_space<vmem>>, %arg3: memref<256x128xbf16, #tpu.memory_space<vmem>>, %arg4: memref<256x128xf32, #tpu.memory_space<vmem>>, %arg5: memref<256x128xbf16, #tpu.memory_space<vmem>>, %arg6: memref<256x128xf32, #tpu.memory_space<vmem>>, %arg7: memref<256x128xf32, #tpu.memory_space<vmem>>) attributes {dimension_semantics = [#tpu.dimension_semantics<parallel>, #tpu.dimension_semantics<arbitrary>], iteration_bounds = array<i64: 1, 1>, scalar_prefetch = 0 : i64, scratch_operands = 1 : i64, tpu.core_type = #tpu.core_type<tc>, window_params = [{transform_indices = @transform_0, window_bounds = array<i64: 256, 256>}, {pipeline_mode = #tpu.pipeline_mode<synchronous>, transform_indices = @transform_1, window_bounds = array<i64: 256, 128>}, {transform_indices = @transform_2, window_bounds = array<i64: 256, 128>}, {transform_indices = @transform_3, window_bounds = array<i64: 256, 128>}, {transform_indices = @transform_4, window_bounds = array<i64: 256, 128>}]} {
    %c0_i32 = arith.constant 0 : i32
    %0 = arith.cmpi eq, %arg1, %c0_i32 : i32
    %1 = arith.extui %0 : i1 to i32
    %c0_i32_0 = arith.constant 0 : i32
    %2 = arith.cmpi ne, %1, %c0_i32_0 : i32
    scf.if %2 {
      %cst_9 = arith.constant 0.000000e+00 : f32
      %15 = vector.broadcast %cst_9 : f32 to vector<256x128xf32>
      %c0_10 = arith.constant 0 : index
      %c0_11 = arith.constant 0 : index
      %16 = vector.load %arg7[%c0_10, %c0_11] : memref<256x128xf32, #tpu.memory_space<vmem>>, vector<256x128xf32>
      tpu.vector_store %arg7[%c0_10, %c0_11], %15 {strides = array<i32>} : memref<256x128xf32, #tpu.memory_space<vmem>>, vector<256x128xf32>,
    } else {
    }
    %c256_i32 = arith.constant 256 : i32
    %3 = arith.muli %arg1, %c256_i32 : i32
    %4 = tpu.assume_multiple %3, 256 : i32
    %5 = arith.index_cast %4 : i32 to index
    %c0 = arith.constant 0 : index
    %6 = vector.load %arg3[%5, %c0] : memref<256x128xbf16, #tpu.memory_space<vmem>>, vector<256x128xbf16>
    %c0_1 = arith.constant 0 : index
    %c0_2 = arith.constant 0 : index
    %7 = vector.load %arg7[%c0_1, %c0_2] : memref<256x128xf32, #tpu.memory_space<vmem>>, vector<256x128xf32>
    %c0_3 = arith.constant 0 : index
    %c0_4 = arith.constant 0 : index
    %8 = vector.load %arg2[%c0_3, %c0_4] : memref<256x256xbf16, #tpu.memory_space<vmem>>, vector<256x256xbf16>
    %cst = arith.constant dense<0.000000e+00> : vector<256x128xf32>
    %9 = tpu.matmul %8, %6, %cst {dimension_numbers = #tpu.dot_dimension_numbers<[1], [0], [0], [1], [0, 0, 1, 1], [], []>} : vector<256x256xbf16>, vector<256x128xbf16>, vector<256x128xf32> -> vector<256x128xf32>
    %10 = arith.addf %7, %9 : vector<256x128xf32>
    %c0_5 = arith.constant 0 : index
    %c0_6 = arith.constant 0 : index
    %11 = vector.load %arg7[%c0_5, %c0_6] : memref<256x128xf32, #tpu.memory_space<vmem>>, vector<256x128xf32>
    tpu.vector_store %arg7[%c0_5, %c0_6], %10 {strides = array<i32>} : memref<256x128xf32, #tpu.memory_space<vmem>>, vector<256x128xf32>,
    %c0_i32_7 = arith.constant 0 : i32
    %12 = arith.cmpi eq, %arg1, %c0_i32_7 : i32
    %13 = arith.extui %12 : i1 to i32
    %c0_i32_8 = arith.constant 0 : i32
    %14 = arith.cmpi ne, %13, %c0_i32_8 : i32
    scf.if %14 {
      %c0_9 = arith.constant 0 : index
      %c0_10 = arith.constant 0 : index
      %15 = vector.load %arg7[%c0_9, %c0_10] : memref<256x128xf32, #tpu.memory_space<vmem>>, vector<256x128xf32>
      %16 = arith.truncf %15 : vector<256x128xf32> to vector<256x128xbf16>
      %c0_11 = arith.constant 0 : index
      %c0_12 = arith.constant 0 : index
      %17 = vector.load %arg5[%c0_11, %c0_12] : memref<256x128xbf16, #tpu.memory_space<vmem>>, vector<256x128xbf16>
      tpu.vector_store %arg5[%c0_11, %c0_12], %16 {strides = array<i32>} : memref<256x128xbf16, #tpu.memory_space<vmem>>, vector<256x128xbf16>,
      %c0_13 = arith.constant 0 : index
      %c0_14 = arith.constant 0 : index
      %18 = vector.load %arg4[%c0_13, %c0_14] : memref<256x128xf32, #tpu.memory_space<vmem>>, vector<256x128xf32>
      %19 = arith.addf %18, %15 : vector<256x128xf32>
      %c0_15 = arith.constant 0 : index
      %c0_16 = arith.constant 0 : index
      %20 = vector.load %arg6[%c0_15, %c0_16] : memref<256x128xf32, #tpu.memory_space<vmem>>, vector<256x128xf32>
      tpu.vector_store %arg6[%c0_15, %c0_16], %19 {strides = array<i32>} : memref<256x128xf32, #tpu.memory_space<vmem>>, vector<256x128xf32>,
    } else {
    }
    return
  }
  func.func @transform_0(%arg0: i32, %arg1: i32) -> (i32, i32) {
    %c0_i32 = arith.constant 0 : i32
    return %arg0, %arg1 : i32, i32
  }
  func.func @transform_1(%arg0: i32, %arg1: i32) -> (i32, i32) {
    %c0_i32 = arith.constant 0 : i32
    %c0_i32_0 = arith.constant 0 : i32
    %c0_i32_1 = arith.constant 0 : i32
    return %c0_i32, %c0_i32_0 : i32, i32
  }
  func.func @transform_2(%arg0: i32, %arg1: i32) -> (i32, i32) {
    %c0_i32 = arith.constant 0 : i32
    %c0_i32_0 = arith.constant 0 : i32
    return %arg0, %c0_i32 : i32, i32
  }
  func.func @transform_3(%arg0: i32, %arg1: i32) -> (i32, i32) {
    %c0_i32 = arith.constant 0 : i32
    %c0_i32_0 = arith.constant 0 : i32
    return %arg0, %c0_i32 : i32, i32
  }
  func.func @transform_4(%arg0: i32, %arg1: i32) -> (i32, i32) {
    %c0_i32 = arith.constant 0 : i32
    %c0_i32_0 = arith.constant 0 : i32
    return %arg0, %c0_i32 : i32, i32
  }
}

</mosaic_0001>

<bundles_post_ra>
// kernel: mul.4
= control target key start
LH: loop header
LB: loop body
LE: loop exit
PB: predicated region body
PF: predicated region fallthrough
CT: control target
= control target key end

     0   :  { %s34_s0 = inlined_call_operand.vmem [shape: f32[256], index: 0, kind: input, shape index: {}]   ;;  %s35_s1 = inlined_call_operand.vmem [shape: f32[256], index: 1, kind: input, shape index: {}]   ;;  %s36_s2 = inlined_call_operand.vmem [shape: f32[256], index: 2, kind: output, shape index: {}]  }
   0x1   :  { %v3_v0 = vld [vmem:[%s34_s0] sm:$0x3] }
   0x2   :  { %v4_v1 = vld [vmem:[%s35_s1] sm:$0x3] }
   0x3   :  { %v7_v2 = vmul.f32 %v4_v1, %v3_v0 }
   0x5   :  { %9 = vst [vmem:[%s36_s2] sm:$0x3] %v7_v2 }

// kernel: lightgcn_forward.3
= control target key start
LH: loop header
LB: loop body
LE: loop exit
PB: predicated region body
PF: predicated region fallthrough
CT: control target
= control target key end

     0   :  { %s1712_s1 = inlined_call_operand.vmem [shape: bf16[256,128], index: 1, kind: input, shape index: {}]   ;;  %s1713_s0 = inlined_call_operand.vmem [shape: bf16[256,256], index: 0, kind: input, shape index: {}]   ;;  %s1714_s2 = inlined_call_operand.vmem [shape: f32[256,128], index: 2, kind: input, shape index: {}, may-alias: {2,4}]   ;;  %s1715_s4 = inlined_call_operand.vmem [shape: f32[256,128], index: 4, kind: output, shape index: {1}, may-alias: {2,4}]   ;;  %s1716_s3 = inlined_call_operand.vmem [shape: bf16[256,128], index: 3, kind: output, shape index: {0}]  }
   0x1   :  { %v1055_v0 = vld [vmem:[%s1712_s1 + $0x38] sm:$0xff]  ;;  %v1054_v2 = vld [vmem:[%s1712_s1 + $0x30] sm:$0xff]  ;;  %v1053_v4 = vld [vmem:[%s1712_s1 + $0x28] sm:$0xff] }
   0x2   :  { %v1063_v1 = vld [vmem:[%s1712_s1 + $0x78] sm:$0xff]  ;;  %409 = vmatpush.bf16.msra.mxu0 %v1055_v0  ;;  %1191 = vmatpush.bf16.msra.mxu2 %v1055_v0  ;;  %v1062_v3 = vld [vmem:[%s1712_s1 + $0x70] sm:$0xff]  ;;  %v1061_v5 = vld [vmem:[%s1712_s1 + $0x68] sm:$0xff] }
   0x3   :  { %498 = vmatpush.bf16.msra.mxu1 %v1063_v1  ;;  %1199 = vmatpush.bf16.msra.mxu3 %v1063_v1  ;;  %v1052_v6 = vld [vmem:[%s1712_s1 + $0x20] sm:$0xff]  ;;  %v1051_v8 = vld [vmem:[%s1712_s1 + $0x18] sm:$0xff]  ;;  %v1050_v10 = vld [vmem:[%s1712_s1 + $0x10] sm:$0xff] }
   0x4   :  { %v1060_v7 = vld [vmem:[%s1712_s1 + $0x60] sm:$0xff]  ;;  %v1059_v9 = vld [vmem:[%s1712_s1 + $0x58] sm:$0xff]  ;;  %v1058_v11 = vld [vmem:[%s1712_s1 + $0x50] sm:$0xff] }
   0x5   :  { %v1049_v12 = vld [vmem:[%s1712_s1 + $0x8] sm:$0xff]  ;;  %v1048_v14 = vld [vmem:[%s1712_s1] sm:$0xff]  ;;  %v866_v28 = vld [vmem:[%s1713_s0 + $0x10] sm:$0xf] }
   0x6   :  { %410 = vmatpush.bf16.msra.mxu0 %v1054_v2  ;;  %1192 = vmatpush.bf16.msra.mxu2 %v1054_v2  ;;  %v1057_v13 = vld [vmem:[%s1712_s1 + $0x48] sm:$0xff]  ;;  %v1056_v15 = vld [vmem:[%s1712_s1 + $0x40] sm:$0xff]  ;;  %v1067_v29 = vld [vmem:[%s1713_s0 + $0x14] sm:$0xf0] }
   0x7   :  { %499 = vmatpush.bf16.msra.mxu1 %v1062_v3  ;;  %1200 = vmatpush.bf16.msra.mxu3 %v1062_v3  ;;  %v858_v16 = vld [vmem:[%s1713_s0] sm:$0xf]  ;;  %v1065_v17 = vld [vmem:[%s1713_s0 + $0x4] sm:$0xf0]  ;;  %v1064_v20 = vld [vmem:[%s1713_s0 + $0x4] sm:$0xf]  ;;  %v867_v36 = vor.u32 %v1067_v29, %v866_v28 }
   0x8   :  { %v922_v18 = vld [vmem:[%s1713_s0 + $0x80] sm:$0xf]  ;;  %v1081_v19 = vld [vmem:[%s1713_s0 + $0x84] sm:$0xf0]  ;;  %v860_v21 = vld [vmem:[%s1713_s0 + $0x8] sm:$0xf0]  ;;  %v859_v24 = vor.u32 %v1065_v17, %v858_v16 }
   0x9   :  { %v1080_v22 = vld [vmem:[%s1713_s0 + $0x84] sm:$0xf]  ;;  %v924_v23 = vld [vmem:[%s1713_s0 + $0x88] sm:$0xf0]  ;;  %v923_v25 = vor.u32 %v1081_v19, %v922_v18  ;;  %v863_v26 = vor.u32 %v1064_v20, %v860_v21  ;;  %v930_v30 = vld [vmem:[%s1713_s0 + $0x90] sm:$0xf] }
   0xa   :  { %411 = vmatpush.bf16.msra.mxu0 %v1053_v4  ;;  %1193 = vmatpush.bf16.msra.mxu2 %v1053_v4  ;;  %v927_v27 = vor.u32 %v1080_v22, %v924_v23  ;;  %v1083_v31 = vld [vmem:[%s1713_s0 + $0x94] sm:$0xf0]  ;;  %v1066_v32 = vld [vmem:[%s1713_s0 + $0x14] sm:$0xf]  ;;  %v868_v33 = vld [vmem:[%s1713_s0 + $0x18] sm:$0xf0] }
   0xb   :  { %500 = vmatpush.bf16.msra.mxu1 %v1061_v5  ;;  %1201 = vmatpush.bf16.msra.mxu3 %v1061_v5  ;;  %v1082_v34 = vld [vmem:[%s1713_s0 + $0x94] sm:$0xf]  ;;  %v932_v35 = vld [vmem:[%s1713_s0 + $0x98] sm:$0xf0]  ;;  %v931_v37 = vor.u32 %v1083_v31, %v930_v30  ;;  %v871_v38 = vor.u32 %v1066_v32, %v868_v33  ;;  %v874_v40 = vld [vmem:[%s1713_s0 + $0x20] sm:$0xf] }
   0xc   :  { %v935_v39 = vor.u32 %v1082_v34, %v932_v35  ;;  %v1069_v41 = vld [vmem:[%s1713_s0 + $0x24] sm:$0xf0]  ;;  %v938_v42 = vld [vmem:[%s1713_s0 + $0xa0] sm:$0xf]  ;;  %v1068_v44 = vld [vmem:[%s1713_s0 + $0x24] sm:$0xf] }
   0xd   :  { %v1085_v43 = vld [vmem:[%s1713_s0 + $0xa4] sm:$0xf0]  ;;  %v876_v45 = vld [vmem:[%s1713_s0 + $0x28] sm:$0xf0]  ;;  %v1084_v46 = vld [vmem:[%s1713_s0 + $0xa4] sm:$0xf]  ;;  %v875_v48 = vor.u32 %v1069_v41, %v874_v40 }
   0xe   :  { %412 = vmatpush.bf16.msra.mxu0 %v1052_v6  ;;  %1194 = vmatpush.bf16.msra.mxu2 %v1052_v6  ;;  %v940_v47 = vld [vmem:[%s1713_s0 + $0xa8] sm:$0xf0]  ;;  %v939_v49 = vor.u32 %v1085_v43, %v938_v42  ;;  %v879_v50 = vor.u32 %v1068_v44, %v876_v45  ;;  %v882_v52 = vld [vmem:[%s1713_s0 + $0x30] sm:$0xf]  ;;  %v1071_v53 = vld [vmem:[%s1713_s0 + $0x34] sm:$0xf0] }
   0xf   :  { %501 = vmatpush.bf16.msra.mxu1 %v1060_v7  ;;  %1202 = vmatpush.bf16.msra.mxu3 %v1060_v7  ;;  %v943_v51 = vor.u32 %v1084_v46, %v940_v47  ;;  %v946_v54 = vld [vmem:[%s1713_s0 + $0xb0] sm:$0xf]  ;;  %v1087_v55 = vld [vmem:[%s1713_s0 + $0xb4] sm:$0xf0]  ;;  %v1070_v56 = vld [vmem:[%s1713_s0 + $0x34] sm:$0xf]  ;;  %v883_v60 = vor.u32 %v1071_v53, %v882_v52 }
  0x10   :  { %v884_v57 = vld [vmem:[%s1713_s0 + $0x38] sm:$0xf0]  ;;  %v1086_v58 = vld [vmem:[%s1713_s0 + $0xb4] sm:$0xf]  ;;  %v947_v61 = vor.u32 %v1087_v55, %v946_v54  ;;  %v890_v0 = vld [vmem:[%s1713_s0 + $0x40] sm:$0xf] }
  0x11   :  { %v948_v59 = vld [vmem:[%s1713_s0 + $0xb8] sm:$0xf0]  ;;  %v887_v62 = vor.u32 %v1070_v56, %v884_v57  ;;  %v1073_v1 = vld [vmem:[%s1713_s0 + $0x44] sm:$0xf0]  ;;  %v954_v2 = vld [vmem:[%s1713_s0 + $0xc0] sm:$0xf] }
  0x12   :  { %413 = vmatpush.bf16.msra.mxu0 %v1051_v8  ;;  %1195 = vmatpush.bf16.msra.mxu2 %v1051_v8  ;;  %v951_v63 = vor.u32 %v1086_v58, %v948_v59  ;;  %v1089_v3 = vld [vmem:[%s1713_s0 + $0xc4] sm:$0xf0]  ;;  %v1072_v4 = vld [vmem:[%s1713_s0 + $0x44] sm:$0xf]  ;;  %v892_v5 = vld [vmem:[%s1713_s0 + $0x48] sm:$0xf0]  ;;  %v891_v8 = vor.u32 %v1073_v1, %v890_v0 }
  0x13   :  { %502 = vmatpush.bf16.msra.mxu1 %v1059_v9  ;;  %1203 = vmatpush.bf16.msra.mxu3 %v1059_v9  ;;  %v1088_v6 = vld [vmem:[%s1713_s0 + $0xc4] sm:$0xf]  ;;  %v956_v7 = vld [vmem:[%s1713_s0 + $0xc8] sm:$0xf0]  ;;  %v955_v9 = vor.u32 %v1089_v3, %v954_v2  ;;  %v1074_v16 = vld [vmem:[%s1713_s0 + $0x54] sm:$0xf] }
  0x14   :  { %v900_v17 = vld [vmem:[%s1713_s0 + $0x58] sm:$0xf0]  ;;  %v1090_v18 = vld [vmem:[%s1713_s0 + $0xd4] sm:$0xf]  ;;  %v1076_v28 = vld [vmem:[%s1713_s0 + $0x64] sm:$0xf] }
  0x15   :  { %v964_v19 = vld [vmem:[%s1713_s0 + $0xd8] sm:$0xf0]  ;;  %v903_v22 = vor.u32 %v1074_v16, %v900_v17  ;;  %v908_v29 = vld [vmem:[%s1713_s0 + $0x68] sm:$0xf0]  ;;  %v1092_v30 = vld [vmem:[%s1713_s0 + $0xe4] sm:$0xf] }
  0x16   :  { %414 = vmatpush.bf16.msra.mxu0 %v1050_v10  ;;  %1196 = vmatpush.bf16.msra.mxu2 %v1050_v10  ;;  %v895_v10 = vor.u32 %v1072_v4, %v892_v5  ;;  %v967_v23 = vor.u32 %v1090_v18, %v964_v19  ;;  %v972_v31 = vld [vmem:[%s1713_s0 + $0xe8] sm:$0xf0]  ;;  %v911_v34 = vor.u32 %v1076_v28, %v908_v29  ;;  %v1078_v40 = vld [vmem:[%s1713_s0 + $0x74] sm:$0xf]  ;;  %v916_v41 = vld [vmem:[%s1713_s0 + $0x78] sm:$0xf0] }
  0x17   :  { %503 = vmatpush.bf16.msra.mxu1 %v1058_v11  ;;  %1204 = vmatpush.bf16.msra.mxu3 %v1058_v11  ;;  %v959_v11 = vor.u32 %v1088_v6, %v956_v7  ;;  %v975_v35 = vor.u32 %v1092_v30, %v972_v31  ;;  %v1094_v42 = vld [vmem:[%s1713_s0 + $0xf4] sm:$0xf]  ;;  %v980_v43 = vld [vmem:[%s1713_s0 + $0xf8] sm:$0xf0]  ;;  %v919_v46 = vor.u32 %v1078_v40, %v916_v41 }
  0x18   :  { %v983_v47 = vor.u32 %v1094_v42, %v980_v43 }
  0x1a   :  { %415 = vmatpush.bf16.msra.mxu0 %v1049_v12  ;;  %1197 = vmatpush.bf16.msra.mxu2 %v1049_v12  ;;  %v898_v12 = vld [vmem:[%s1713_s0 + $0x50] sm:$0xf] }
  0x1b   :  { %504 = vmatpush.bf16.msra.mxu1 %v1057_v13  ;;  %1205 = vmatpush.bf16.msra.mxu3 %v1057_v13  ;;  %v1075_v13 = vld [vmem:[%s1713_s0 + $0x54] sm:$0xf0] }
  0x1c   :  { %v899_v20 = vor.u32 %v1075_v13, %v898_v12 }
  0x1e   :  { %416 = vmatpush.bf16.msra.mxu0 %v1048_v14  ;;  %1198 = vmatpush.bf16.msra.mxu2 %v1048_v14  ;;  %v962_v14 = vld [vmem:[%s1713_s0 + $0xd0] sm:$0xf] }
  0x1f   :  { %505 = vmatpush.bf16.msra.mxu1 %v1056_v15  ;;  %1206 = vmatpush.bf16.msra.mxu3 %v1056_v15  ;;  %v1091_v15 = vld [vmem:[%s1713_s0 + $0xd4] sm:$0xf0] }
  0x20   :  { %v963_v21 = vor.u32 %v1091_v15, %v962_v14 }
  0x21   :  { %417 = vmatmul.bf16.vlgmr.msra.gmra.mxu0 %v859_v24  ;;  %457 = vmatmul.bf16.vlgmr.msra.gmra.mxu2 %v923_v25  ;;  %v906_v24 = vld [vmem:[%s1713_s0 + $0x60] sm:$0xf]  ;;  %v1077_v25 = vld [vmem:[%s1713_s0 + $0x64] sm:$0xf0] }
  0x22   :  { %506 = vmatmul.bf16.vlgmr.msra.gmra.mxu1 %v863_v26  ;;  %546 = vmatmul.bf16.vlgmr.msra.gmra.mxu3 %v927_v27  ;;  %v970_v26 = vld [vmem:[%s1713_s0 + $0xe0] sm:$0xf]  ;;  %v1093_v27 = vld [vmem:[%s1713_s0 + $0xe4] sm:$0xf0]  ;;  %v907_v32 = vor.u32 %v1077_v25, %v906_v24 }
  0x23   :  { %v971_v33 = vor.u32 %v1093_v27, %v970_v26 }
  0x31   :  { %422 = vmatmul.bf16.gmra.mxu0 %v867_v36  ;;  %462 = vmatmul.bf16.gmra.mxu2 %v931_v37  ;;  %v914_v36 = vld [vmem:[%s1713_s0 + $0x70] sm:$0xf]  ;;  %v1079_v37 = vld [vmem:[%s1713_s0 + $0x74] sm:$0xf0] }
  0x32   :  { %511 = vmatmul.bf16.gmra.mxu1 %v871_v38  ;;  %551 = vmatmul.bf16.gmra.mxu3 %v935_v39  ;;  %v978_v38 = vld [vmem:[%s1713_s0 + $0xf0] sm:$0xf]  ;;  %v1095_v39 = vld [vmem:[%s1713_s0 + $0xf4] sm:$0xf0]  ;;  %v915_v44 = vor.u32 %v1079_v37, %v914_v36 }
  0x33   :  { %v979_v45 = vor.u32 %v1095_v39, %v978_v38 }
  0x41   :  { %427 = vmatmul.bf16.gmra.mxu0 %v875_v48  ;;  %467 = vmatmul.bf16.gmra.mxu2 %v939_v49 }
  0x42   :  { %516 = vmatmul.bf16.gmra.mxu1 %v879_v50  ;;  %556 = vmatmul.bf16.gmra.mxu3 %v943_v51  ;;  %v750_v50 = vld [vmem:[%s1714_s2] sm:$0xff] }
  0x51   :  { %432 = vmatmul.bf16.gmra.mxu0 %v883_v60  ;;  %472 = vmatmul.bf16.gmra.mxu2 %v947_v61 }
  0x52   :  { %521 = vmatmul.bf16.gmra.mxu1 %v887_v62  ;;  %561 = vmatmul.bf16.gmra.mxu3 %v951_v63 }
  0x61   :  { %437 = vmatmul.bf16.gmra.mxu0 %v891_v8  ;;  %477 = vmatmul.bf16.gmra.mxu2 %v955_v9 }
  0x62   :  { %526 = vmatmul.bf16.gmra.mxu1 %v895_v10  ;;  %566 = vmatmul.bf16.gmra.mxu3 %v959_v11 }
  0x71   :  { %442 = vmatmul.bf16.gmra.mxu0 %v899_v20  ;;  %482 = vmatmul.bf16.gmra.mxu2 %v963_v21 }
  0x72   :  { %531 = vmatmul.bf16.gmra.mxu1 %v903_v22  ;;  %571 = vmatmul.bf16.gmra.mxu3 %v967_v23 }
  0x81   :  { %447 = vmatmul.bf16.gmra.mxu0 %v907_v32  ;;  %487 = vmatmul.bf16.gmra.mxu2 %v971_v33 }
  0x82   :  { %536 = vmatmul.bf16.gmra.mxu1 %v911_v34  ;;  %576 = vmatmul.bf16.gmra.mxu3 %v975_v35 }
  0x91   :  { %452 = vmatmul.bf16.gmra.mxu0 %v915_v44  ;;  %492 = vmatmul.bf16.gmra.mxu2 %v979_v45 }
  0x92   :  { %541 = vmatmul.bf16.gmra.mxu1 %v919_v46  ;;  %581 = vmatmul.bf16.gmra.mxu3 %v983_v47 }
  0x9e   :  { %v418_v48 = vpop.f32.mrf.mxu0 }
  0x9f   :  { %v507_v49 = vpop.f32.mrf.mxu1 }
  0xa0   :  { %v508_v51 = vadd.f32 %v507_v49, %v418_v48 }
  0xa2   :  { %v782_v52 = vadd.f32 %v750_v50, %v508_v51 }
  0xa4   :  { %814 = vst [vmem:[%s1715_s4] sm:$0xff] %v782_v52  ;;  %v458_v53 = vpop.f32.mrf.mxu2 }
  0xa5   :  { %v547_v54 = vpop.f32.mrf.mxu3 }
  0xa6   :  { %v548_v56 = vadd.f32 %v547_v54, %v458_v53  ;;  %v420_v57 = vpop.f32.mrf.mxu0 }
  0xa7   :  { %v509_v58 = vpop.f32.mrf.mxu1 }
  0xa8   :  { %v510_v61 = vadd.f32 %v509_v58, %v420_v57 }
  0xaa   :  { %v1099_v62 = vpack.c.bf16 %v510_v61, %v508_v51 }
  0xab   :  { %v766_v55 = vld [vmem:[%s1714_s2 + $0x80] sm:$0xff]  ;;  %v751_v59 = vld [vmem:[%s1714_s2 + $0x8] sm:$0xff] }
  0xac   :  { %v798_v60 = vadd.f32 %v766_v55, %v548_v56  ;;  %v783_v63 = vadd.f32 %v751_v59, %v510_v61  ;;  %1100 = vst [vmem:[%s1716_s3] sm:$0xff] %v1099_v62   ;;  %v460_v0 = vpop.f32.mrf.mxu2 }
  0xad   :  { %v549_v1 = vpop.f32.mrf.mxu3 }
  0xae   :  { %830 = vst [vmem:[%s1715_s4 + $0x80] sm:$0xff] %v798_v60  ;;  %v550_v3 = vadd.f32 %v549_v1, %v460_v0  ;;  %v423_v4 = vpop.f32.mrf.mxu0 }
  0xaf   :  { %815 = vst [vmem:[%s1715_s4 + $0x8] sm:$0xff] %v783_v63  ;;  %v512_v5 = vpop.f32.mrf.mxu1 }
  0xb0   :  { %v1139_v7 = vpack.c.bf16 %v550_v3, %v548_v56  ;;  %v513_v9 = vadd.f32 %v512_v5, %v423_v4 }
  0xb2   :  { %1183 = vst [vmem:[%s1716_s3 + $0x40] sm:$0xff] %v1139_v7  }
  0xb4   :  { %v463_v11 = vpop.f32.mrf.mxu2 }
  0xb5   :  { %v552_v12 = vpop.f32.mrf.mxu3 }
  0xb6   :  { %v767_v2 = vld [vmem:[%s1714_s2 + $0x88] sm:$0xff]  ;;  %v752_v6 = vld [vmem:[%s1714_s2 + $0x10] sm:$0xff]  ;;  %v553_v14 = vadd.f32 %v552_v12, %v463_v11  ;;  %v425_v15 = vpop.f32.mrf.mxu0 }
  0xb7   :  { %v799_v8 = vadd.f32 %v767_v2, %v550_v3  ;;  %v784_v10 = vadd.f32 %v752_v6, %v513_v9  ;;  %v514_v16 = vpop.f32.mrf.mxu1 }
  0xb8   :  { %v515_v19 = vadd.f32 %v514_v16, %v425_v15 }
  0xb9   :  { %831 = vst [vmem:[%s1715_s4 + $0x88] sm:$0xff] %v799_v8 }
  0xba   :  { %816 = vst [vmem:[%s1715_s4 + $0x10] sm:$0xff] %v784_v10  ;;  %v1104_v20 = vpack.c.bf16 %v515_v19, %v513_v9 }
  0xbc   :  { %1176 = vst [vmem:[%s1716_s3 + $0x8] sm:$0xff] %v1104_v20   ;;  %v465_v22 = vpop.f32.mrf.mxu2 }
  0xbd   :  { %v554_v23 = vpop.f32.mrf.mxu3 }
  0xbe   :  { %v555_v25 = vadd.f32 %v554_v23, %v465_v22  ;;  %v428_v26 = vpop.f32.mrf.mxu0 }
  0xbf   :  { %v517_v27 = vpop.f32.mrf.mxu1 }
  0xc0   :  { %v1144_v29 = vpack.c.bf16 %v555_v25, %v553_v14  ;;  %v518_v31 = vadd.f32 %v517_v27, %v428_v26 }
  0xc1   :  { %v768_v13 = vld [vmem:[%s1714_s2 + $0x90] sm:$0xff]  ;;  %v753_v17 = vld [vmem:[%s1714_s2 + $0x18] sm:$0xff] }
  0xc2   :  { %v800_v18 = vadd.f32 %v768_v13, %v553_v14  ;;  %v785_v21 = vadd.f32 %v753_v17, %v515_v19  ;;  %1184 = vst [vmem:[%s1716_s3 + $0x48] sm:$0xff] %v1144_v29  }
  0xc4   :  { %832 = vst [vmem:[%s1715_s4 + $0x90] sm:$0xff] %v800_v18  ;;  %v468_v33 = vpop.f32.mrf.mxu2 }
  0xc5   :  { %817 = vst [vmem:[%s1715_s4 + $0x18] sm:$0xff] %v785_v21  ;;  %v557_v34 = vpop.f32.mrf.mxu3 }
  0xc6   :  { %v558_v36 = vadd.f32 %v557_v34, %v468_v33  ;;  %v430_v37 = vpop.f32.mrf.mxu0 }
  0xc7   :  { %v519_v38 = vpop.f32.mrf.mxu1 }
  0xc8   :  { %v520_v41 = vadd.f32 %v519_v38, %v430_v37 }
  0xca   :  { %v1109_v42 = vpack.c.bf16 %v520_v41, %v518_v31 }
  0xcc   :  { %v769_v24 = vld [vmem:[%s1714_s2 + $0x98] sm:$0xff]  ;;  %v754_v28 = vld [vmem:[%s1714_s2 + $0x20] sm:$0xff]  ;;  %1177 = vst [vmem:[%s1716_s3 + $0x10] sm:$0xff] %v1109_v42   ;;  %v470_v44 = vpop.f32.mrf.mxu2 }
  0xcd   :  { %v801_v30 = vadd.f32 %v769_v24, %v555_v25  ;;  %v786_v32 = vadd.f32 %v754_v28, %v518_v31  ;;  %v559_v45 = vpop.f32.mrf.mxu3 }
  0xce   :  { %v560_v47 = vadd.f32 %v559_v45, %v470_v44  ;;  %v433_v48 = vpop.f32.mrf.mxu0 }
  0xcf   :  { %833 = vst [vmem:[%s1715_s4 + $0x98] sm:$0xff] %v801_v30  ;;  %v522_v49 = vpop.f32.mrf.mxu1 }
  0xd0   :  { %818 = vst [vmem:[%s1715_s4 + $0x20] sm:$0xff] %v786_v32  ;;  %v1149_v51 = vpack.c.bf16 %v560_v47, %v558_v36  ;;  %v523_v53 = vadd.f32 %v522_v49, %v433_v48 }
  0xd2   :  { %1185 = vst [vmem:[%s1716_s3 + $0x50] sm:$0xff] %v1149_v51  }
  0xd4   :  { %v473_v55 = vpop.f32.mrf.mxu2 }
  0xd5   :  { %v562_v56 = vpop.f32.mrf.mxu3 }
  0xd6   :  { %v563_v58 = vadd.f32 %v562_v56, %v473_v55  ;;  %v435_v59 = vpop.f32.mrf.mxu0 }
  0xd7   :  { %v770_v35 = vld [vmem:[%s1714_s2 + $0xa0] sm:$0xff]  ;;  %v755_v39 = vld [vmem:[%s1714_s2 + $0x28] sm:$0xff]  ;;  %v524_v60 = vpop.f32.mrf.mxu1 }
  0xd8   :  { %v802_v40 = vadd.f32 %v770_v35, %v558_v36  ;;  %v787_v43 = vadd.f32 %v755_v39, %v520_v41  ;;  %v525_v63 = vadd.f32 %v524_v60, %v435_v59 }
  0xda   :  { %834 = vst [vmem:[%s1715_s4 + $0xa0] sm:$0xff] %v802_v40  ;;  %v1114_v0 = vpack.c.bf16 %v525_v63, %v523_v53 }
  0xdb   :  { %819 = vst [vmem:[%s1715_s4 + $0x28] sm:$0xff] %v787_v43 }
  0xdc   :  { %1178 = vst [vmem:[%s1716_s3 + $0x18] sm:$0xff] %v1114_v0   ;;  %v475_v2 = vpop.f32.mrf.mxu2 }
  0xdd   :  { %v564_v3 = vpop.f32.mrf.mxu3 }
  0xde   :  { %v565_v5 = vadd.f32 %v564_v3, %v475_v2  ;;  %v438_v6 = vpop.f32.mrf.mxu0 }
  0xdf   :  { %v527_v7 = vpop.f32.mrf.mxu1 }
  0xe0   :  { %v1154_v9 = vpack.c.bf16 %v565_v5, %v563_v58  ;;  %v528_v11 = vadd.f32 %v527_v7, %v438_v6 }
  0xe2   :  { %v771_v46 = vld [vmem:[%s1714_s2 + $0xa8] sm:$0xff]  ;;  %v756_v50 = vld [vmem:[%s1714_s2 + $0x30] sm:$0xff]  ;;  %1186 = vst [vmem:[%s1716_s3 + $0x58] sm:$0xff] %v1154_v9  }
  0xe3   :  { %v803_v52 = vadd.f32 %v771_v46, %v560_v47  ;;  %v788_v54 = vadd.f32 %v756_v50, %v523_v53 }
  0xe4   :  { %v478_v13 = vpop.f32.mrf.mxu2 }
  0xe5   :  { %835 = vst [vmem:[%s1715_s4 + $0xa8] sm:$0xff] %v803_v52  ;;  %v567_v14 = vpop.f32.mrf.mxu3 }
  0xe6   :  { %820 = vst [vmem:[%s1715_s4 + $0x30] sm:$0xff] %v788_v54  ;;  %v568_v16 = vadd.f32 %v567_v14, %v478_v13  ;;  %v440_v17 = vpop.f32.mrf.mxu0 }
  0xe7   :  { %v529_v18 = vpop.f32.mrf.mxu1 }
  0xe8   :  { %v530_v21 = vadd.f32 %v529_v18, %v440_v17 }
  0xea   :  { %v1119_v22 = vpack.c.bf16 %v530_v21, %v528_v11 }
  0xec   :  { %1179 = vst [vmem:[%s1716_s3 + $0x20] sm:$0xff] %v1119_v22   ;;  %v480_v24 = vpop.f32.mrf.mxu2 }
  0xed   :  { %v772_v57 = vld [vmem:[%s1714_s2 + $0xb0] sm:$0xff]  ;;  %v757_v61 = vld [vmem:[%s1714_s2 + $0x38] sm:$0xff]  ;;  %v569_v25 = vpop.f32.mrf.mxu3 }
  0xee   :  { %v804_v62 = vadd.f32 %v772_v57, %v563_v58  ;;  %v789_v1 = vadd.f32 %v757_v61, %v525_v63  ;;  %v570_v27 = vadd.f32 %v569_v25, %v480_v24  ;;  %v443_v28 = vpop.f32.mrf.mxu0 }
  0xef   :  { %v532_v29 = vpop.f32.mrf.mxu1 }
  0xf0   :  { %836 = vst [vmem:[%s1715_s4 + $0xb0] sm:$0xff] %v804_v62  ;;  %v1159_v31 = vpack.c.bf16 %v570_v27, %v568_v16  ;;  %v533_v33 = vadd.f32 %v532_v29, %v443_v28 }
  0xf1   :  { %821 = vst [vmem:[%s1715_s4 + $0x38] sm:$0xff] %v789_v1 }
  0xf2   :  { %1187 = vst [vmem:[%s1716_s3 + $0x60] sm:$0xff] %v1159_v31  }
  0xf4   :  { %v483_v35 = vpop.f32.mrf.mxu2 }
  0xf5   :  { %v572_v36 = vpop.f32.mrf.mxu3 }
  0xf6   :  { %v573_v38 = vadd.f32 %v572_v36, %v483_v35  ;;  %v445_v39 = vpop.f32.mrf.mxu0 }
  0xf7   :  { %v534_v40 = vpop.f32.mrf.mxu1 }
  0xf8   :  { %v773_v4 = vld [vmem:[%s1714_s2 + $0xb8] sm:$0xff]  ;;  %v758_v8 = vld [vmem:[%s1714_s2 + $0x40] sm:$0xff]  ;;  %v535_v43 = vadd.f32 %v534_v40, %v445_v39 }
  0xf9   :  { %v805_v10 = vadd.f32 %v773_v4, %v565_v5  ;;  %v790_v12 = vadd.f32 %v758_v8, %v528_v11 }
  0xfa   :  { %v1124_v44 = vpack.c.bf16 %v535_v43, %v533_v33 }
  0xfb   :  { %837 = vst [vmem:[%s1715_s4 + $0xb8] sm:$0xff] %v805_v10 }
  0xfc   :  { %822 = vst [vmem:[%s1715_s4 + $0x40] sm:$0xff] %v790_v12  ;;  %v485_v46 = vpop.f32.mrf.mxu2 }
  0xfd   :  { %1180 = vst [vmem:[%s1716_s3 + $0x28] sm:$0xff] %v1124_v44   ;;  %v574_v47 = vpop.f32.mrf.mxu3 }
  0xfe   :  { %v575_v49 = vadd.f32 %v574_v47, %v485_v46  ;;  %v448_v50 = vpop.f32.mrf.mxu0 }
  0xff   :  { %v537_v51 = vpop.f32.mrf.mxu1 }
 0x100   :  { %v1164_v53 = vpack.c.bf16 %v575_v49, %v573_v38  ;;  %v538_v55 = vadd.f32 %v537_v51, %v448_v50 }
 0x102   :  { %1188 = vst [vmem:[%s1716_s3 + $0x68] sm:$0xff] %v1164_v53  }
 0x103   :  { %v774_v15 = vld [vmem:[%s1714_s2 + $0xc0] sm:$0xff]  ;;  %v759_v19 = vld [vmem:[%s1714_s2 + $0x48] sm:$0xff] }
 0x104   :  { %v806_v20 = vadd.f32 %v774_v15, %v568_v16  ;;  %v791_v23 = vadd.f32 %v759_v19, %v530_v21  ;;  %v488_v57 = vpop.f32.mrf.mxu2 }
 0x105   :  { %v577_v58 = vpop.f32.mrf.mxu3 }
 0x106   :  { %838 = vst [vmem:[%s1715_s4 + $0xc0] sm:$0xff] %v806_v20  ;;  %v578_v60 = vadd.f32 %v577_v58, %v488_v57  ;;  %v450_v61 = vpop.f32.mrf.mxu0 }
 0x107   :  { %823 = vst [vmem:[%s1715_s4 + $0x48] sm:$0xff] %v791_v23  ;;  %v539_v62 = vpop.f32.mrf.mxu1 }
 0x108   :  { %v540_v1 = vadd.f32 %v539_v62, %v450_v61 }
 0x10a   :  { %v1129_v2 = vpack.c.bf16 %v540_v1, %v538_v55 }
 0x10c   :  { %1181 = vst [vmem:[%s1716_s3 + $0x30] sm:$0xff] %v1129_v2   ;;  %v490_v4 = vpop.f32.mrf.mxu2 }
 0x10d   :  { %v579_v5 = vpop.f32.mrf.mxu3 }
 0x10e   :  { %v775_v26 = vld [vmem:[%s1714_s2 + $0xc8] sm:$0xff]  ;;  %v760_v30 = vld [vmem:[%s1714_s2 + $0x50] sm:$0xff]  ;;  %v580_v7 = vadd.f32 %v579_v5, %v490_v4  ;;  %v453_v8 = vpop.f32.mrf.mxu0 }
 0x10f   :  { %v807_v32 = vadd.f32 %v775_v26, %v570_v27  ;;  %v792_v34 = vadd.f32 %v760_v30, %v533_v33  ;;  %v542_v9 = vpop.f32.mrf.mxu1 }
 0x110   :  { %v1169_v11 = vpack.c.bf16 %v580_v7, %v578_v60  ;;  %v543_v13 = vadd.f32 %v542_v9, %v453_v8 }
 0x111   :  { %839 = vst [vmem:[%s1715_s4 + $0xc8] sm:$0xff] %v807_v32 }
 0x112   :  { %824 = vst [vmem:[%s1715_s4 + $0x50] sm:$0xff] %v792_v34 }
 0x113   :  { %1189 = vst [vmem:[%s1716_s3 + $0x70] sm:$0xff] %v1169_v11  }
 0x114   :  { %v493_v15 = vpop.f32.mrf.mxu2 }
 0x115   :  { %v582_v16 = vpop.f32.mrf.mxu3 }
 0x116   :  { %v583_v18 = vadd.f32 %v582_v16, %v493_v15  ;;  %v455_v19 = vpop.f32.mrf.mxu0 }
 0x117   :  { %v544_v20 = vpop.f32.mrf.mxu1 }
 0x118   :  { %v545_v23 = vadd.f32 %v544_v20, %v455_v19 }
 0x119   :  { %v776_v37 = vld [vmem:[%s1714_s2 + $0xd0] sm:$0xff]  ;;  %v761_v41 = vld [vmem:[%s1714_s2 + $0x58] sm:$0xff] }
 0x11a   :  { %v808_v42 = vadd.f32 %v776_v37, %v573_v38  ;;  %v793_v45 = vadd.f32 %v761_v41, %v535_v43  ;;  %v1134_v24 = vpack.c.bf16 %v545_v23, %v543_v13 }
 0x11c   :  { %840 = vst [vmem:[%s1715_s4 + $0xd0] sm:$0xff] %v808_v42  ;;  %v495_v26 = vpop.f32.mrf.mxu2 }
 0x11d   :  { %825 = vst [vmem:[%s1715_s4 + $0x58] sm:$0xff] %v793_v45  ;;  %v584_v27 = vpop.f32.mrf.mxu3 }
 0x11e   :  { %1182 = vst [vmem:[%s1716_s3 + $0x38] sm:$0xff] %v1134_v24   ;;  %v585_v29 = vadd.f32 %v584_v27, %v495_v26 }
 0x120   :  { %v1174_v30 = vpack.c.bf16 %v585_v29, %v583_v18 }
 0x122   :  { %1190 = vst [vmem:[%s1716_s3 + $0x78] sm:$0xff] %v1174_v30  }
 0x124   :  { %v777_v48 = vld [vmem:[%s1714_s2 + $0xd8] sm:$0xff]  ;;  %v762_v52 = vld [vmem:[%s1714_s2 + $0x60] sm:$0xff] }
 0x125   :  { %v809_v54 = vadd.f32 %v777_v48, %v575_v49  ;;  %v794_v56 = vadd.f32 %v762_v52, %v538_v55 }
 0x127   :  { %841 = vst [vmem:[%s1715_s4 + $0xd8] sm:$0xff] %v809_v54 }
 0x128   :  { %826 = vst [vmem:[%s1715_s4 + $0x60] sm:$0xff] %v794_v56 }
 0x12f   :  { %v778_v59 = vld [vmem:[%s1714_s2 + $0xe0] sm:$0xff]  ;;  %v763_v63 = vld [vmem:[%s1714_s2 + $0x68] sm:$0xff] }
 0x130   :  { %v810_v0 = vadd.f32 %v778_v59, %v578_v60  ;;  %v795_v3 = vadd.f32 %v763_v63, %v540_v1 }
 0x132   :  { %842 = vst [vmem:[%s1715_s4 + $0xe0] sm:$0xff] %v810_v0 }
 0x133   :  { %827 = vst [vmem:[%s1715_s4 + $0x68] sm:$0xff] %v795_v3 }
 0x13a   :  { %v779_v6 = vld [vmem:[%s1714_s2 + $0xe8] sm:$0xff]  ;;  %v764_v10 = vld [vmem:[%s1714_s2 + $0x70] sm:$0xff] }
 0x13b   :  { %v811_v12 = vadd.f32 %v779_v6, %v580_v7  ;;  %v796_v14 = vadd.f32 %v764_v10, %v543_v13 }
 0x13d   :  { %843 = vst [vmem:[%s1715_s4 + $0xe8] sm:$0xff] %v811_v12 }
 0x13e   :  { %828 = vst [vmem:[%s1715_s4 + $0x70] sm:$0xff] %v796_v14 }
 0x145   :  { %v780_v17 = vld [vmem:[%s1714_s2 + $0xf0] sm:$0xff]  ;;  %v765_v21 = vld [vmem:[%s1714_s2 + $0x78] sm:$0xff] }
 0x146   :  { %v812_v22 = vadd.f32 %v780_v17, %v583_v18  ;;  %v797_v25 = vadd.f32 %v765_v21, %v545_v23 }
 0x148   :  { %844 = vst [vmem:[%s1715_s4 + $0xf0] sm:$0xff] %v812_v22 }
 0x149   :  { %829 = vst [vmem:[%s1715_s4 + $0x78] sm:$0xff] %v797_v25 }
 0x150   :  { %v781_v28 = vld [vmem:[%s1714_s2 + $0xf8] sm:$0xff] }
 0x151   :  { %v813_v31 = vadd.f32 %v781_v28, %v585_v29 }
 0x153   :  { %845 = vst [vmem:[%s1715_s4 + $0xf8] sm:$0xff] %v813_v31 }

// kernel: lightgcn_forward.5
= control target key start
LH: loop header
LB: loop body
LE: loop exit
PB: predicated region body
PF: predicated region fallthrough
CT: control target
= control target key end

     0   :  { %s1714_s0 = inlined_call_operand.vmem [shape: bf16[256,256], index: 0, kind: input, shape index: {}]   ;;  %s1715_s1 = inlined_call_operand.vmem [shape: bf16[256,128], index: 1, kind: input, shape index: {}]   ;;  %s1716_s2 = inlined_call_operand.vmem [shape: f32[256,128], index: 2, kind: input, shape index: {}, may-alias: {2,4}]   ;;  %s1717_s3 = inlined_call_operand.hbm [shape: bf16[256,128], index: 3, kind: output, shape index: {0}]   ;;  %s1718_s4 = inlined_call_operand.vmem [shape: f32[256,128], index: 4, kind: output, shape index: {1}, may-alias: {2,4}]  }
   0x1   :  { %v1070_v0 = vld [vmem:[%s1715_s1 + $0x38] sm:$0xff]  ;;  %v1069_v2 = vld [vmem:[%s1715_s1 + $0x30] sm:$0xff]  ;;  %v1068_v4 = vld [vmem:[%s1715_s1 + $0x28] sm:$0xff] }
   0x2   :  { %v1078_v1 = vld [vmem:[%s1715_s1 + $0x78] sm:$0xff]  ;;  %410 = vmatpush.bf16.msra.mxu0 %v1070_v0  ;;  %1206 = vmatpush.bf16.msra.mxu2 %v1070_v0  ;;  %v1077_v3 = vld [vmem:[%s1715_s1 + $0x70] sm:$0xff]  ;;  %v1076_v5 = vld [vmem:[%s1715_s1 + $0x68] sm:$0xff] }
   0x3   :  { %499 = vmatpush.bf16.msra.mxu1 %v1078_v1  ;;  %1214 = vmatpush.bf16.msra.mxu3 %v1078_v1 }
   0x6   :  { %411 = vmatpush.bf16.msra.mxu0 %v1069_v2  ;;  %1207 = vmatpush.bf16.msra.mxu2 %v1069_v2 }
   0x7   :  { %500 = vmatpush.bf16.msra.mxu1 %v1077_v3  ;;  %1215 = vmatpush.bf16.msra.mxu3 %v1077_v3 }
   0x8   :  { %10 = vsyncpa [#allocation4], 0  ;;  %v1067_v6 = vld [vmem:[%s1715_s1 + $0x20] sm:$0xff]  ;;  %v1066_v8 = vld [vmem:[%s1715_s1 + $0x18] sm:$0xff]  ;;  %s1251_s27 = smov [#allocation3]   ;;  %s853_s30 = sshll.u32 %s1717_s3, 4  ;;  %s854_s30 = int_to_ptr.hbm [resolvable:$true] %s853_s30 }
   0x9   :  { %v1075_v7 = vld [vmem:[%s1715_s1 + $0x60] sm:$0xff]  ;;  %v1074_v9 = vld [vmem:[%s1715_s1 + $0x58] sm:$0xff]  ;;  %v1065_v10 = vld [vmem:[%s1715_s1 + $0x10] sm:$0xff]  ;;  %s851_s28 = sshll.u32 %s1251_s27, 4  ;;  %s1252_s7 = smov 64   ;;  %s852_s28 = int_to_ptr.vmem [resolvable:$true] %s851_s28 }
   0xa   :  { %412 = vmatpush.bf16.msra.mxu0 %v1068_v4  ;;  %1208 = vmatpush.bf16.msra.mxu2 %v1068_v4  ;;  %v1073_v11 = vld [vmem:[%s1715_s1 + $0x50] sm:$0xff]  ;;  %v1064_v12 = vld [vmem:[%s1715_s1 + $0x8] sm:$0xff]  ;;  %v1063_v14 = vld [vmem:[%s1715_s1] sm:$0xff]  ;;  %s1253_s8 = smov 4  }
   0xb   :  { %501 = vmatpush.bf16.msra.mxu1 %v1076_v5  ;;  %1216 = vmatpush.bf16.msra.mxu3 %v1076_v5  ;;  %v1072_v13 = vld [vmem:[%s1715_s1 + $0x48] sm:$0xff]  ;;  %v1071_v15 = vld [vmem:[%s1715_s1 + $0x40] sm:$0xff]  ;;  %v881_v28 = vld [vmem:[%s1714_s0 + $0x10] sm:$0xf] }
   0xc   :  { %v873_v16 = vld [vmem:[%s1714_s0] sm:$0xf]  ;;  %v1080_v17 = vld [vmem:[%s1714_s0 + $0x4] sm:$0xf0]  ;;  %v1079_v20 = vld [vmem:[%s1714_s0 + $0x4] sm:$0xf] }
   0xd   :  { %v937_v18 = vld [vmem:[%s1714_s0 + $0x80] sm:$0xf]  ;;  %v1096_v19 = vld [vmem:[%s1714_s0 + $0x84] sm:$0xf0]  ;;  %v875_v21 = vld [vmem:[%s1714_s0 + $0x8] sm:$0xf0]  ;;  %v874_v24 = vor.u32 %v1080_v17, %v873_v16 }
   0xe   :  { %413 = vmatpush.bf16.msra.mxu0 %v1067_v6  ;;  %1209 = vmatpush.bf16.msra.mxu2 %v1067_v6  ;;  %v1095_v22 = vld [vmem:[%s1714_s0 + $0x84] sm:$0xf]  ;;  %v939_v23 = vld [vmem:[%s1714_s0 + $0x88] sm:$0xf0]  ;;  %v938_v25 = vor.u32 %v1096_v19, %v937_v18  ;;  %v878_v26 = vor.u32 %v1079_v20, %v875_v21  ;;  %v1082_v29 = vld [vmem:[%s1714_s0 + $0x14] sm:$0xf0] }
   0xf   :  { %502 = vmatpush.bf16.msra.mxu1 %v1075_v7  ;;  %1217 = vmatpush.bf16.msra.mxu3 %v1075_v7  ;;  %v942_v27 = vor.u32 %v1095_v22, %v939_v23  ;;  %v945_v30 = vld [vmem:[%s1714_s0 + $0x90] sm:$0xf]  ;;  %v1098_v31 = vld [vmem:[%s1714_s0 + $0x94] sm:$0xf0]  ;;  %v1081_v32 = vld [vmem:[%s1714_s0 + $0x14] sm:$0xf]  ;;  %v882_v36 = vor.u32 %v1082_v29, %v881_v28 }
  0x10   :  { %v883_v33 = vld [vmem:[%s1714_s0 + $0x18] sm:$0xf0]  ;;  %v1097_v34 = vld [vmem:[%s1714_s0 + $0x94] sm:$0xf]  ;;  %v946_v37 = vor.u32 %v1098_v31, %v945_v30  ;;  %v889_v40 = vld [vmem:[%s1714_s0 + $0x20] sm:$0xf] }
  0x11   :  { %v947_v35 = vld [vmem:[%s1714_s0 + $0x98] sm:$0xf0]  ;;  %v886_v38 = vor.u32 %v1081_v32, %v883_v33  ;;  %v1084_v41 = vld [vmem:[%s1714_s0 + $0x24] sm:$0xf0]  ;;  %v953_v42 = vld [vmem:[%s1714_s0 + $0xa0] sm:$0xf] }
  0x12   :  { %414 = vmatpush.bf16.msra.mxu0 %v1066_v8  ;;  %1210 = vmatpush.bf16.msra.mxu2 %v1066_v8  ;;  %v950_v39 = vor.u32 %v1097_v34, %v947_v35  ;;  %v1100_v43 = vld [vmem:[%s1714_s0 + $0xa4] sm:$0xf0]  ;;  %v1083_v44 = vld [vmem:[%s1714_s0 + $0x24] sm:$0xf]  ;;  %v891_v45 = vld [vmem:[%s1714_s0 + $0x28] sm:$0xf0]  ;;  %v890_v48 = vor.u32 %v1084_v41, %v889_v40 }
  0x13   :  { %503 = vmatpush.bf16.msra.mxu1 %v1074_v9  ;;  %1218 = vmatpush.bf16.msra.mxu3 %v1074_v9  ;;  %v1099_v46 = vld [vmem:[%s1714_s0 + $0xa4] sm:$0xf]  ;;  %v955_v47 = vld [vmem:[%s1714_s0 + $0xa8] sm:$0xf0]  ;;  %v954_v49 = vor.u32 %v1100_v43, %v953_v42  ;;  %v894_v50 = vor.u32 %v1083_v44, %v891_v45  ;;  %v897_v52 = vld [vmem:[%s1714_s0 + $0x30] sm:$0xf] }
  0x14   :  { %v958_v51 = vor.u32 %v1099_v46, %v955_v47  ;;  %v1086_v53 = vld [vmem:[%s1714_s0 + $0x34] sm:$0xf0]  ;;  %v961_v54 = vld [vmem:[%s1714_s0 + $0xb0] sm:$0xf]  ;;  %v1085_v56 = vld [vmem:[%s1714_s0 + $0x34] sm:$0xf] }
  0x15   :  { %v1102_v55 = vld [vmem:[%s1714_s0 + $0xb4] sm:$0xf0]  ;;  %v899_v57 = vld [vmem:[%s1714_s0 + $0x38] sm:$0xf0]  ;;  %v1101_v58 = vld [vmem:[%s1714_s0 + $0xb4] sm:$0xf]  ;;  %v898_v60 = vor.u32 %v1086_v53, %v897_v52 }
  0x16   :  { %415 = vmatpush.bf16.msra.mxu0 %v1065_v10  ;;  %1211 = vmatpush.bf16.msra.mxu2 %v1065_v10  ;;  %v963_v59 = vld [vmem:[%s1714_s0 + $0xb8] sm:$0xf0]  ;;  %v962_v61 = vor.u32 %v1102_v55, %v961_v54  ;;  %v902_v62 = vor.u32 %v1085_v56, %v899_v57  ;;  %v905_v0 = vld [vmem:[%s1714_s0 + $0x40] sm:$0xf]  ;;  %v1088_v1 = vld [vmem:[%s1714_s0 + $0x44] sm:$0xf0] }
  0x17   :  { %504 = vmatpush.bf16.msra.mxu1 %v1073_v11  ;;  %1219 = vmatpush.bf16.msra.mxu3 %v1073_v11  ;;  %v966_v63 = vor.u32 %v1101_v58, %v963_v59  ;;  %v969_v2 = vld [vmem:[%s1714_s0 + $0xc0] sm:$0xf]  ;;  %v1104_v3 = vld [vmem:[%s1714_s0 + $0xc4] sm:$0xf0]  ;;  %v1087_v4 = vld [vmem:[%s1714_s0 + $0x44] sm:$0xf]  ;;  %v906_v8 = vor.u32 %v1088_v1, %v905_v0 }
  0x18   :  { %v907_v5 = vld [vmem:[%s1714_s0 + $0x48] sm:$0xf0]  ;;  %v1103_v6 = vld [vmem:[%s1714_s0 + $0xc4] sm:$0xf]  ;;  %v970_v9 = vor.u32 %v1104_v3, %v969_v2  ;;  %v1089_v16 = vld [vmem:[%s1714_s0 + $0x54] sm:$0xf] }
  0x19   :  { %v971_v7 = vld [vmem:[%s1714_s0 + $0xc8] sm:$0xf0]  ;;  %v910_v10 = vor.u32 %v1087_v4, %v907_v5  ;;  %v915_v17 = vld [vmem:[%s1714_s0 + $0x58] sm:$0xf0]  ;;  %v1105_v18 = vld [vmem:[%s1714_s0 + $0xd4] sm:$0xf] }
  0x1a   :  { %416 = vmatpush.bf16.msra.mxu0 %v1064_v12  ;;  %1212 = vmatpush.bf16.msra.mxu2 %v1064_v12  ;;  %v974_v11 = vor.u32 %v1103_v6, %v971_v7  ;;  %v913_v12 = vld [vmem:[%s1714_s0 + $0x50] sm:$0xf]  ;;  %v979_v19 = vld [vmem:[%s1714_s0 + $0xd8] sm:$0xf0]  ;;  %v918_v22 = vor.u32 %v1089_v16, %v915_v17  ;;  %v1091_v28 = vld [vmem:[%s1714_s0 + $0x64] sm:$0xf] }
  0x1b   :  { %505 = vmatpush.bf16.msra.mxu1 %v1072_v13  ;;  %1220 = vmatpush.bf16.msra.mxu3 %v1072_v13  ;;  %v1090_v13 = vld [vmem:[%s1714_s0 + $0x54] sm:$0xf0]  ;;  %v982_v23 = vor.u32 %v1105_v18, %v979_v19  ;;  %v923_v29 = vld [vmem:[%s1714_s0 + $0x68] sm:$0xf0]  ;;  %v1107_v30 = vld [vmem:[%s1714_s0 + $0xe4] sm:$0xf] }
  0x1c   :  { %v914_v20 = vor.u32 %v1090_v13, %v913_v12  ;;  %v987_v31 = vld [vmem:[%s1714_s0 + $0xe8] sm:$0xf0]  ;;  %v926_v34 = vor.u32 %v1091_v28, %v923_v29  ;;  %v1093_v40 = vld [vmem:[%s1714_s0 + $0x74] sm:$0xf]  ;;  %v931_v41 = vld [vmem:[%s1714_s0 + $0x78] sm:$0xf0] }
  0x1d   :  { %v990_v35 = vor.u32 %v1107_v30, %v987_v31  ;;  %v1109_v42 = vld [vmem:[%s1714_s0 + $0xf4] sm:$0xf]  ;;  %v995_v43 = vld [vmem:[%s1714_s0 + $0xf8] sm:$0xf0]  ;;  %v934_v46 = vor.u32 %v1093_v40, %v931_v41 }
  0x1e   :  { %417 = vmatpush.bf16.msra.mxu0 %v1063_v14  ;;  %1213 = vmatpush.bf16.msra.mxu2 %v1063_v14  ;;  %v977_v14 = vld [vmem:[%s1714_s0 + $0xd0] sm:$0xf]  ;;  %v998_v47 = vor.u32 %v1109_v42, %v995_v43 }
  0x1f   :  { %506 = vmatpush.bf16.msra.mxu1 %v1071_v15  ;;  %1221 = vmatpush.bf16.msra.mxu3 %v1071_v15  ;;  %v1106_v15 = vld [vmem:[%s1714_s0 + $0xd4] sm:$0xf0] }
  0x20   :  { %v978_v21 = vor.u32 %v1106_v15, %v977_v14 }
  0x21   :  { %418 = vmatmul.bf16.vlgmr.msra.gmra.mxu0 %v874_v24  ;;  %458 = vmatmul.bf16.vlgmr.msra.gmra.mxu2 %v938_v25  ;;  %v921_v24 = vld [vmem:[%s1714_s0 + $0x60] sm:$0xf]  ;;  %v1092_v25 = vld [vmem:[%s1714_s0 + $0x64] sm:$0xf0] }
  0x22   :  { %507 = vmatmul.bf16.vlgmr.msra.gmra.mxu1 %v878_v26  ;;  %547 = vmatmul.bf16.vlgmr.msra.gmra.mxu3 %v942_v27  ;;  %v985_v26 = vld [vmem:[%s1714_s0 + $0xe0] sm:$0xf]  ;;  %v1108_v27 = vld [vmem:[%s1714_s0 + $0xe4] sm:$0xf0]  ;;  %v922_v32 = vor.u32 %v1092_v25, %v921_v24 }
  0x23   :  { %v986_v33 = vor.u32 %v1108_v27, %v985_v26 }
  0x31   :  { %423 = vmatmul.bf16.gmra.mxu0 %v882_v36  ;;  %463 = vmatmul.bf16.gmra.mxu2 %v946_v37  ;;  %v929_v36 = vld [vmem:[%s1714_s0 + $0x70] sm:$0xf]  ;;  %v1094_v37 = vld [vmem:[%s1714_s0 + $0x74] sm:$0xf0] }
  0x32   :  { %512 = vmatmul.bf16.gmra.mxu1 %v886_v38  ;;  %552 = vmatmul.bf16.gmra.mxu3 %v950_v39  ;;  %v993_v38 = vld [vmem:[%s1714_s0 + $0xf0] sm:$0xf]  ;;  %v1110_v39 = vld [vmem:[%s1714_s0 + $0xf4] sm:$0xf0]  ;;  %v930_v44 = vor.u32 %v1094_v37, %v929_v36 }
  0x33   :  { %v994_v45 = vor.u32 %v1110_v39, %v993_v38 }
  0x41   :  { %428 = vmatmul.bf16.gmra.mxu0 %v890_v48  ;;  %468 = vmatmul.bf16.gmra.mxu2 %v954_v49 }
  0x42   :  { %517 = vmatmul.bf16.gmra.mxu1 %v894_v50  ;;  %557 = vmatmul.bf16.gmra.mxu3 %v958_v51  ;;  %v751_v50 = vld [vmem:[%s1716_s2] sm:$0xff] }
  0x51   :  { %433 = vmatmul.bf16.gmra.mxu0 %v898_v60  ;;  %473 = vmatmul.bf16.gmra.mxu2 %v962_v61 }
  0x52   :  { %522 = vmatmul.bf16.gmra.mxu1 %v902_v62  ;;  %562 = vmatmul.bf16.gmra.mxu3 %v966_v63 }
  0x61   :  { %438 = vmatmul.bf16.gmra.mxu0 %v906_v8  ;;  %478 = vmatmul.bf16.gmra.mxu2 %v970_v9 }
  0x62   :  { %527 = vmatmul.bf16.gmra.mxu1 %v910_v10  ;;  %567 = vmatmul.bf16.gmra.mxu3 %v974_v11 }
  0x71   :  { %443 = vmatmul.bf16.gmra.mxu0 %v914_v20  ;;  %483 = vmatmul.bf16.gmra.mxu2 %v978_v21 }
  0x72   :  { %532 = vmatmul.bf16.gmra.mxu1 %v918_v22  ;;  %572 = vmatmul.bf16.gmra.mxu3 %v982_v23 }
  0x81   :  { %448 = vmatmul.bf16.gmra.mxu0 %v922_v32  ;;  %488 = vmatmul.bf16.gmra.mxu2 %v986_v33 }
  0x82   :  { %537 = vmatmul.bf16.gmra.mxu1 %v926_v34  ;;  %577 = vmatmul.bf16.gmra.mxu3 %v990_v35 }
  0x91   :  { %453 = vmatmul.bf16.gmra.mxu0 %v930_v44  ;;  %493 = vmatmul.bf16.gmra.mxu2 %v994_v45 }
  0x92   :  { %542 = vmatmul.bf16.gmra.mxu1 %v934_v46  ;;  %582 = vmatmul.bf16.gmra.mxu3 %v998_v47 }
  0x9e   :  { %v419_v48 = vpop.f32.mrf.mxu0 }
  0x9f   :  { %v508_v49 = vpop.f32.mrf.mxu1 }
  0xa0   :  { %v509_v51 = vadd.f32 %v508_v49, %v419_v48 }
  0xa2   :  { %v783_v52 = vadd.f32 %v751_v50, %v509_v51 }
  0xa4   :  { %815 = vst [vmem:[%s1718_s4] sm:$0xff] %v783_v52  ;;  %v459_v53 = vpop.f32.mrf.mxu2 }
  0xa5   :  { %v548_v54 = vpop.f32.mrf.mxu3 }
  0xa6   :  { %v549_v56 = vadd.f32 %v548_v54, %v459_v53  ;;  %v421_v57 = vpop.f32.mrf.mxu0 }
  0xa7   :  { %v510_v58 = vpop.f32.mrf.mxu1 }
  0xa8   :  { %v511_v61 = vadd.f32 %v510_v58, %v421_v57 }
  0xaa   :  { %v1114_v62 = vpack.c.bf16 %v511_v61, %v509_v51 }
  0xab   :  { %v767_v55 = vld [vmem:[%s1716_s2 + $0x80] sm:$0xff]  ;;  %v752_v59 = vld [vmem:[%s1716_s2 + $0x8] sm:$0xff] }
  0xac   :  { %v799_v60 = vadd.f32 %v767_v55, %v549_v56  ;;  %v784_v63 = vadd.f32 %v752_v59, %v511_v61  ;;  %1115 = vst [vmem:[#allocation3] sm:$0xff] %v1114_v62   ;;  %v461_v0 = vpop.f32.mrf.mxu2 }
  0xad   :  { %v550_v1 = vpop.f32.mrf.mxu3 }
  0xae   :  { %831 = vst [vmem:[%s1718_s4 + $0x80] sm:$0xff] %v799_v60  ;;  %v551_v3 = vadd.f32 %v550_v1, %v461_v0  ;;  %v424_v4 = vpop.f32.mrf.mxu0 }
  0xaf   :  { %816 = vst [vmem:[%s1718_s4 + $0x8] sm:$0xff] %v784_v63  ;;  %v513_v5 = vpop.f32.mrf.mxu1 }
  0xb0   :  { %v1154_v7 = vpack.c.bf16 %v551_v3, %v549_v56  ;;  %v514_v9 = vadd.f32 %v513_v5, %v424_v4 }
  0xb2   :  { %1198 = vst [vmem:[#allocation3 + $0x40] sm:$0xff] %v1154_v7  }
  0xb4   :  { %v464_v11 = vpop.f32.mrf.mxu2 }
  0xb5   :  { %v553_v12 = vpop.f32.mrf.mxu3 }
  0xb6   :  { %v768_v2 = vld [vmem:[%s1716_s2 + $0x88] sm:$0xff]  ;;  %v753_v6 = vld [vmem:[%s1716_s2 + $0x10] sm:$0xff]  ;;  %v554_v14 = vadd.f32 %v553_v12, %v464_v11  ;;  %v426_v15 = vpop.f32.mrf.mxu0 }
  0xb7   :  { %v800_v8 = vadd.f32 %v768_v2, %v551_v3  ;;  %v785_v10 = vadd.f32 %v753_v6, %v514_v9  ;;  %v515_v16 = vpop.f32.mrf.mxu1 }
  0xb8   :  { %v516_v19 = vadd.f32 %v515_v16, %v426_v15 }
  0xb9   :  { %832 = vst [vmem:[%s1718_s4 + $0x88] sm:$0xff] %v800_v8 }
  0xba   :  { %817 = vst [vmem:[%s1718_s4 + $0x10] sm:$0xff] %v785_v10  ;;  %v1119_v20 = vpack.c.bf16 %v516_v19, %v514_v9 }
  0xbc   :  { %1191 = vst [vmem:[#allocation3 + $0x8] sm:$0xff] %v1119_v20   ;;  %v466_v22 = vpop.f32.mrf.mxu2 }
  0xbd   :  { %v555_v23 = vpop.f32.mrf.mxu3 }
  0xbe   :  { %v556_v25 = vadd.f32 %v555_v23, %v466_v22  ;;  %v429_v26 = vpop.f32.mrf.mxu0 }
  0xbf   :  { %v518_v27 = vpop.f32.mrf.mxu1 }
  0xc0   :  { %v1159_v29 = vpack.c.bf16 %v556_v25, %v554_v14  ;;  %v519_v31 = vadd.f32 %v518_v27, %v429_v26 }
  0xc1   :  { %v769_v13 = vld [vmem:[%s1716_s2 + $0x90] sm:$0xff]  ;;  %v754_v17 = vld [vmem:[%s1716_s2 + $0x18] sm:$0xff] }
  0xc2   :  { %v801_v18 = vadd.f32 %v769_v13, %v554_v14  ;;  %v786_v21 = vadd.f32 %v754_v17, %v516_v19  ;;  %1199 = vst [vmem:[#allocation3 + $0x48] sm:$0xff] %v1159_v29  }
  0xc4   :  { %833 = vst [vmem:[%s1718_s4 + $0x90] sm:$0xff] %v801_v18  ;;  %v469_v33 = vpop.f32.mrf.mxu2 }
  0xc5   :  { %818 = vst [vmem:[%s1718_s4 + $0x18] sm:$0xff] %v786_v21  ;;  %v558_v34 = vpop.f32.mrf.mxu3 }
  0xc6   :  { %v559_v36 = vadd.f32 %v558_v34, %v469_v33  ;;  %v431_v37 = vpop.f32.mrf.mxu0 }
  0xc7   :  { %v520_v38 = vpop.f32.mrf.mxu1 }
  0xc8   :  { %v521_v41 = vadd.f32 %v520_v38, %v431_v37 }
  0xca   :  { %v1124_v42 = vpack.c.bf16 %v521_v41, %v519_v31 }
  0xcc   :  { %v770_v24 = vld [vmem:[%s1716_s2 + $0x98] sm:$0xff]  ;;  %v755_v28 = vld [vmem:[%s1716_s2 + $0x20] sm:$0xff]  ;;  %1192 = vst [vmem:[#allocation3 + $0x10] sm:$0xff] %v1124_v42   ;;  %v471_v44 = vpop.f32.mrf.mxu2 }
  0xcd   :  { %v802_v30 = vadd.f32 %v770_v24, %v556_v25  ;;  %v787_v32 = vadd.f32 %v755_v28, %v519_v31  ;;  %v560_v45 = vpop.f32.mrf.mxu3 }
  0xce   :  { %v561_v47 = vadd.f32 %v560_v45, %v471_v44  ;;  %v434_v48 = vpop.f32.mrf.mxu0 }
  0xcf   :  { %834 = vst [vmem:[%s1718_s4 + $0x98] sm:$0xff] %v802_v30  ;;  %v523_v49 = vpop.f32.mrf.mxu1 }
  0xd0   :  { %819 = vst [vmem:[%s1718_s4 + $0x20] sm:$0xff] %v787_v32  ;;  %v1164_v51 = vpack.c.bf16 %v561_v47, %v559_v36  ;;  %v524_v53 = vadd.f32 %v523_v49, %v434_v48 }
  0xd2   :  { %1200 = vst [vmem:[#allocation3 + $0x50] sm:$0xff] %v1164_v51  }
  0xd4   :  { %v474_v55 = vpop.f32.mrf.mxu2 }
  0xd5   :  { %v563_v56 = vpop.f32.mrf.mxu3 }
  0xd6   :  { %v564_v58 = vadd.f32 %v563_v56, %v474_v55  ;;  %v436_v59 = vpop.f32.mrf.mxu0 }
  0xd7   :  { %v771_v35 = vld [vmem:[%s1716_s2 + $0xa0] sm:$0xff]  ;;  %v756_v39 = vld [vmem:[%s1716_s2 + $0x28] sm:$0xff]  ;;  %v525_v60 = vpop.f32.mrf.mxu1 }
  0xd8   :  { %v803_v40 = vadd.f32 %v771_v35, %v559_v36  ;;  %v788_v43 = vadd.f32 %v756_v39, %v521_v41  ;;  %v526_v63 = vadd.f32 %v525_v60, %v436_v59 }
  0xda   :  { %835 = vst [vmem:[%s1718_s4 + $0xa0] sm:$0xff] %v803_v40  ;;  %v1129_v0 = vpack.c.bf16 %v526_v63, %v524_v53 }
  0xdb   :  { %820 = vst [vmem:[%s1718_s4 + $0x28] sm:$0xff] %v788_v43 }
  0xdc   :  { %1193 = vst [vmem:[#allocation3 + $0x18] sm:$0xff] %v1129_v0   ;;  %v476_v2 = vpop.f32.mrf.mxu2 }
  0xdd   :  { %v565_v3 = vpop.f32.mrf.mxu3 }
  0xde   :  { %v566_v5 = vadd.f32 %v565_v3, %v476_v2  ;;  %v439_v6 = vpop.f32.mrf.mxu0 }
  0xdf   :  { %v528_v7 = vpop.f32.mrf.mxu1 }
  0xe0   :  { %v1169_v9 = vpack.c.bf16 %v566_v5, %v564_v58  ;;  %v529_v11 = vadd.f32 %v528_v7, %v439_v6 }
  0xe2   :  { %v772_v46 = vld [vmem:[%s1716_s2 + $0xa8] sm:$0xff]  ;;  %v757_v50 = vld [vmem:[%s1716_s2 + $0x30] sm:$0xff]  ;;  %1201 = vst [vmem:[#allocation3 + $0x58] sm:$0xff] %v1169_v9  }
  0xe3   :  { %v804_v52 = vadd.f32 %v772_v46, %v561_v47  ;;  %v789_v54 = vadd.f32 %v757_v50, %v524_v53 }
  0xe4   :  { %v479_v13 = vpop.f32.mrf.mxu2 }
  0xe5   :  { %836 = vst [vmem:[%s1718_s4 + $0xa8] sm:$0xff] %v804_v52  ;;  %v568_v14 = vpop.f32.mrf.mxu3 }
  0xe6   :  { %821 = vst [vmem:[%s1718_s4 + $0x30] sm:$0xff] %v789_v54  ;;  %v569_v16 = vadd.f32 %v568_v14, %v479_v13  ;;  %v441_v17 = vpop.f32.mrf.mxu0 }
  0xe7   :  { %v530_v18 = vpop.f32.mrf.mxu1 }
  0xe8   :  { %v531_v21 = vadd.f32 %v530_v18, %v441_v17 }
  0xea   :  { %v1134_v22 = vpack.c.bf16 %v531_v21, %v529_v11 }
  0xec   :  { %1194 = vst [vmem:[#allocation3 + $0x20] sm:$0xff] %v1134_v22   ;;  %v481_v24 = vpop.f32.mrf.mxu2 }
  0xed   :  { %v773_v57 = vld [vmem:[%s1716_s2 + $0xb0] sm:$0xff]  ;;  %v758_v61 = vld [vmem:[%s1716_s2 + $0x38] sm:$0xff]  ;;  %v570_v25 = vpop.f32.mrf.mxu3 }
  0xee   :  { %v805_v62 = vadd.f32 %v773_v57, %v564_v58  ;;  %v790_v1 = vadd.f32 %v758_v61, %v526_v63  ;;  %v571_v27 = vadd.f32 %v570_v25, %v481_v24  ;;  %v444_v28 = vpop.f32.mrf.mxu0 }
  0xef   :  { %v533_v29 = vpop.f32.mrf.mxu1 }
  0xf0   :  { %837 = vst [vmem:[%s1718_s4 + $0xb0] sm:$0xff] %v805_v62  ;;  %v1174_v31 = vpack.c.bf16 %v571_v27, %v569_v16  ;;  %v534_v33 = vadd.f32 %v533_v29, %v444_v28 }
  0xf1   :  { %822 = vst [vmem:[%s1718_s4 + $0x38] sm:$0xff] %v790_v1 }
  0xf2   :  { %1202 = vst [vmem:[#allocation3 + $0x60] sm:$0xff] %v1174_v31  }
  0xf4   :  { %v484_v35 = vpop.f32.mrf.mxu2 }
  0xf5   :  { %v573_v36 = vpop.f32.mrf.mxu3 }
  0xf6   :  { %v574_v38 = vadd.f32 %v573_v36, %v484_v35  ;;  %v446_v39 = vpop.f32.mrf.mxu0 }
  0xf7   :  { %v535_v40 = vpop.f32.mrf.mxu1 }
  0xf8   :  { %v774_v4 = vld [vmem:[%s1716_s2 + $0xb8] sm:$0xff]  ;;  %v759_v8 = vld [vmem:[%s1716_s2 + $0x40] sm:$0xff]  ;;  %v536_v43 = vadd.f32 %v535_v40, %v446_v39 }
  0xf9   :  { %v806_v10 = vadd.f32 %v774_v4, %v566_v5  ;;  %v791_v12 = vadd.f32 %v759_v8, %v529_v11 }
  0xfa   :  { %v1139_v44 = vpack.c.bf16 %v536_v43, %v534_v33 }
  0xfb   :  { %838 = vst [vmem:[%s1718_s4 + $0xb8] sm:$0xff] %v806_v10 }
  0xfc   :  { %823 = vst [vmem:[%s1718_s4 + $0x40] sm:$0xff] %v791_v12  ;;  %v486_v46 = vpop.f32.mrf.mxu2 }
  0xfd   :  { %1195 = vst [vmem:[#allocation3 + $0x28] sm:$0xff] %v1139_v44   ;;  %v575_v47 = vpop.f32.mrf.mxu3 }
  0xfe   :  { %v576_v49 = vadd.f32 %v575_v47, %v486_v46  ;;  %v449_v50 = vpop.f32.mrf.mxu0 }
  0xff   :  { %v538_v51 = vpop.f32.mrf.mxu1 }
 0x100   :  { %v1179_v53 = vpack.c.bf16 %v576_v49, %v574_v38  ;;  %v539_v55 = vadd.f32 %v538_v51, %v449_v50 }
 0x102   :  { %1203 = vst [vmem:[#allocation3 + $0x68] sm:$0xff] %v1179_v53  }
 0x103   :  { %v775_v15 = vld [vmem:[%s1716_s2 + $0xc0] sm:$0xff]  ;;  %v760_v19 = vld [vmem:[%s1716_s2 + $0x48] sm:$0xff] }
 0x104   :  { %v807_v20 = vadd.f32 %v775_v15, %v569_v16  ;;  %v792_v23 = vadd.f32 %v760_v19, %v531_v21  ;;  %v489_v57 = vpop.f32.mrf.mxu2 }
 0x105   :  { %v578_v58 = vpop.f32.mrf.mxu3 }
 0x106   :  { %839 = vst [vmem:[%s1718_s4 + $0xc0] sm:$0xff] %v807_v20  ;;  %v579_v60 = vadd.f32 %v578_v58, %v489_v57  ;;  %v451_v61 = vpop.f32.mrf.mxu0 }
 0x107   :  { %824 = vst [vmem:[%s1718_s4 + $0x48] sm:$0xff] %v792_v23  ;;  %v540_v62 = vpop.f32.mrf.mxu1 }
 0x108   :  { %v541_v1 = vadd.f32 %v540_v62, %v451_v61 }
 0x10a   :  { %v1144_v2 = vpack.c.bf16 %v541_v1, %v539_v55 }
 0x10c   :  { %1196 = vst [vmem:[#allocation3 + $0x30] sm:$0xff] %v1144_v2   ;;  %v491_v4 = vpop.f32.mrf.mxu2 }
 0x10d   :  { %v580_v5 = vpop.f32.mrf.mxu3 }
 0x10e   :  { %v776_v26 = vld [vmem:[%s1716_s2 + $0xc8] sm:$0xff]  ;;  %v761_v30 = vld [vmem:[%s1716_s2 + $0x50] sm:$0xff]  ;;  %v581_v7 = vadd.f32 %v580_v5, %v491_v4  ;;  %v454_v8 = vpop.f32.mrf.mxu0 }
 0x10f   :  { %v808_v32 = vadd.f32 %v776_v26, %v571_v27  ;;  %v793_v34 = vadd.f32 %v761_v30, %v534_v33  ;;  %v543_v9 = vpop.f32.mrf.mxu1 }
 0x110   :  { %v1184_v11 = vpack.c.bf16 %v581_v7, %v579_v60  ;;  %v544_v13 = vadd.f32 %v543_v9, %v454_v8 }
 0x111   :  { %840 = vst [vmem:[%s1718_s4 + $0xc8] sm:$0xff] %v808_v32 }
 0x112   :  { %825 = vst [vmem:[%s1718_s4 + $0x50] sm:$0xff] %v793_v34 }
 0x113   :  { %1204 = vst [vmem:[#allocation3 + $0x70] sm:$0xff] %v1184_v11  }
 0x114   :  { %v494_v15 = vpop.f32.mrf.mxu2 }
 0x115   :  { %v583_v16 = vpop.f32.mrf.mxu3 }
 0x116   :  { %v584_v18 = vadd.f32 %v583_v16, %v494_v15  ;;  %v456_v19 = vpop.f32.mrf.mxu0 }
 0x117   :  { %v545_v20 = vpop.f32.mrf.mxu1 }
 0x118   :  { %v546_v23 = vadd.f32 %v545_v20, %v456_v19 }
 0x119   :  { %v777_v37 = vld [vmem:[%s1716_s2 + $0xd0] sm:$0xff]  ;;  %v762_v41 = vld [vmem:[%s1716_s2 + $0x58] sm:$0xff] }
 0x11a   :  { %v809_v42 = vadd.f32 %v777_v37, %v574_v38  ;;  %v794_v45 = vadd.f32 %v762_v41, %v536_v43  ;;  %v1149_v24 = vpack.c.bf16 %v546_v23, %v544_v13 }
 0x11c   :  { %841 = vst [vmem:[%s1718_s4 + $0xd0] sm:$0xff] %v809_v42  ;;  %v496_v26 = vpop.f32.mrf.mxu2 }
 0x11d   :  { %826 = vst [vmem:[%s1718_s4 + $0x58] sm:$0xff] %v794_v45  ;;  %v585_v27 = vpop.f32.mrf.mxu3 }
 0x11e   :  { %1197 = vst [vmem:[#allocation3 + $0x38] sm:$0xff] %v1149_v24   ;;  %v586_v29 = vadd.f32 %v585_v27, %v496_v26 }
 0x120   :  { %v1189_v30 = vpack.c.bf16 %v586_v29, %v584_v18 }
 0x122   :  { %1205 = vst [vmem:[#allocation3 + $0x78] sm:$0xff] %v1189_v30  }
 0x123   :  { %859 = dma.vmem_to_hbm [thread:$0]  %s852_s28, 2048, %s854_s30, [#allocation4], %s1252_s7, %s1252_s7, %s1253_s8  }
 0x124   :  { %v778_v48 = vld [vmem:[%s1716_s2 + $0xd8] sm:$0xff]  ;;  %v763_v52 = vld [vmem:[%s1716_s2 + $0x60] sm:$0xff] }
 0x125   :  { %v810_v54 = vadd.f32 %v778_v48, %v576_v49  ;;  %v795_v56 = vadd.f32 %v763_v52, %v539_v55 }
 0x127   :  { %842 = vst [vmem:[%s1718_s4 + $0xd8] sm:$0xff] %v810_v54 }
 0x128   :  { %827 = vst [vmem:[%s1718_s4 + $0x60] sm:$0xff] %v795_v56 }
 0x12f   :  { %v779_v59 = vld [vmem:[%s1716_s2 + $0xe0] sm:$0xff]  ;;  %v764_v63 = vld [vmem:[%s1716_s2 + $0x68] sm:$0xff] }
 0x130   :  { %v811_v0 = vadd.f32 %v779_v59, %v579_v60  ;;  %v796_v3 = vadd.f32 %v764_v63, %v541_v1 }
 0x132   :  { %843 = vst [vmem:[%s1718_s4 + $0xe0] sm:$0xff] %v811_v0 }
 0x133   :  { %828 = vst [vmem:[%s1718_s4 + $0x68] sm:$0xff] %v796_v3 }
 0x13a   :  { %v780_v6 = vld [vmem:[%s1716_s2 + $0xe8] sm:$0xff]  ;;  %v765_v10 = vld [vmem:[%s1716_s2 + $0x70] sm:$0xff] }
 0x13b   :  { %v812_v12 = vadd.f32 %v780_v6, %v581_v7  ;;  %v797_v14 = vadd.f32 %v765_v10, %v544_v13 }
 0x13d   :  { %844 = vst [vmem:[%s1718_s4 + $0xe8] sm:$0xff] %v812_v12 }
 0x13e   :  { %829 = vst [vmem:[%s1718_s4 + $0x70] sm:$0xff] %v797_v14 }
 0x145   :  { %v781_v17 = vld [vmem:[%s1716_s2 + $0xf0] sm:$0xff]  ;;  %v766_v21 = vld [vmem:[%s1716_s2 + $0x78] sm:$0xff] }
 0x146   :  { %v813_v22 = vadd.f32 %v781_v17, %v584_v18  ;;  %v798_v25 = vadd.f32 %v766_v21, %v546_v23 }
 0x148   :  { %845 = vst [vmem:[%s1718_s4 + $0xf0] sm:$0xff] %v813_v22 }
 0x149   :  { %830 = vst [vmem:[%s1718_s4 + $0x78] sm:$0xff] %v798_v25 }
 0x150   :  { %v782_v28 = vld [vmem:[%s1716_s2 + $0xf8] sm:$0xff] }
 0x151   :  { %v814_v31 = vadd.f32 %v782_v28, %v586_v29 }
 0x153   :  { %846 = vst [vmem:[%s1718_s4 + $0xf8] sm:$0xff] %v814_v31 }
 0x154   :  { %1249 = dma.done.wait [#allocation4], 2048  }
 0x155   :  { %1250 = vsyncadd [#allocation4], 4294965248 }
 0x156   :  { %868 = vsyncpa [#allocation4], 1 }

</bundles_post_ra>
